<compile_context>
chip_gen: v5e
topology: v5e:2x2
jax: 0.10.0
libtpu: 0.0.40
codegen_flags: <defaults>
</compile_context>

<pallas_src>
import functools

import jax
import jax.numpy as jnp
from jax.experimental import pallas as pl
from jax.experimental.pallas import tpu as pltpu

# ---------------- model hyper-parameters (defaults from the module) ----------
NUM_CLASSES = 5        # C
EMBEDDING_DIM = 64     # E
LATENT_SIZE = 256      # L
SIGMA = 0.3
GAMMA = 0.999          # only used by the (training-only) EMA buffer update

# surrogate encoder sizes
POINT_FEATS = 4        # F (x, y, z, value)
HIDDEN = 128           # H -- multiple of 128 keeps all activations lane-dense

CLASS_PAD = 128        # y scores padded to one full lane tile (unmasked vst)
MAX_BATCH_TILE = 256   # rows/step; fills v6e/v7x MXU M (use 128 on v5e if desired)


# ---------------- fused Pallas kernel ----------------------------------------
def _fused_kernel(pc_ref, w1_ref, b1_ref, wz_ref, bz_ref, mu_ref, sel_ref,
                  z_ref, y_ref, *, hidden, num_points, compute_dtype):
    """PointNet-surrogate encoder + DUQ head for one batch tile of TB rows.

    pc_ref:  (TB, P*F)      lane-dense packed points (pc[b, p*F + f])
    w1_ref:  (P*F, P*H)     kron(I_P, enc_w1): block-diagonal per-point layer-1
    b1_ref:  (1, P*H)       enc_b1 tiled P times
    wz_ref:  (H, EC)        enc_w2 @ w2d (fused encoder-head projection)
    bz_ref:  (1, EC)        enc_b2 @ w2d
    mu_ref:  (1, EC)        class centroids m/N, flattened & class-padded
    sel_ref: (EC, 128)      selector with 1/(E*2*sigma^2) folded in
    z_ref:   (TB, EC)       embedding (flat, class-padded)
    y_ref:   (TB, 128)      padded per-class RBF scores
    """
    # ---- per-point MLP: one lane-dense matmul, K = P*F --------------------
    pc = pc_ref[...].astype(compute_dtype)                      # bf16 operands
    h = jnp.dot(pc, w1_ref[...], preferred_element_type=jnp.float32)
    h = jnp.maximum(h + b1_ref[...], 0.0)                       # (TB, P*H) f32

    # ---- max-pool over points: P-1 lane-aligned VPU maxes (no relayout) ---
    pooled = h[:, :hidden]
    for p in range(1, num_points):
        pooled = jnp.maximum(pooled, h[:, p * hidden:(p + 1) * hidden])

    # ---- fused encoder layer-2 + DUQ projection ---------------------------
    # z[b, e*C_pad + c] = sum_l feats[b, l] * w[e, c, l]
    z = jnp.dot(pooled.astype(compute_dtype), wz_ref[...],
                preferred_element_type=jnp.float32) + bz_ref[...]   # (TB, EC)
    z_ref[...] = z

    # ---- RBF / bilinear score ----------------------------------------------
    diff = z - mu_ref[...]                                       # broadcast (1, EC)
    # selector matmul sums diff^2 over the embedding axis per class;
    # 1/(E * 2*sigma^2) is pre-folded into sel -> y = exp(-sumsq) directly.
    sumsq = jnp.dot((diff * diff).astype(compute_dtype), sel_ref[...],
                    preferred_element_type=jnp.float32)          # (TB, 128)
    y_ref[...] = jnp.exp(-sumsq)


# ---------------- one-time parameter preparation ------------------------------
def prepare_params(params, num_points, *, compute_dtype=jnp.bfloat16):
    """Hoist all per-call glue into a one-time, kernel-ready layout."""
    E, C, L = params["w"].shape
    F, H = params["enc_w1"].shape
    P = num_points

    # pad the class axis so E*C_pad is a multiple of 128 -> unmasked z stores
    C_pad = C
    while (E * C_pad) % 128:
        C_pad += 1
    EC = E * C_pad

    # layer-1 packed block-diagonally so the point tile stays lane-dense
    # (valid for modest P; size grows as P^2 * F * H)
    w1_big = jnp.kron(jnp.eye(P, dtype=jnp.float32), params["enc_w1"])   # (P*F, P*H)
    b1_big = jnp.tile(params["enc_b1"], (1, P))                          # (1, P*H)

    # fuse encoder layer-2 with the DUQ projection w (class-padded with zeros)
    w_pad = jnp.pad(params["w"], ((0, 0), (0, C_pad - C), (0, 0)))       # (E, C_pad, L)
    w2d = jnp.transpose(w_pad.reshape(EC, L))                            # (L, EC)
    wz = params["enc_w2"] @ w2d                                          # (H, EC)
    bz = params["enc_b2"] @ w2d                                          # (1, EC)

    centroids = params["m"] / params["N"][None, :]                       # (E, C)
    mu = jnp.pad(centroids, ((0, 0), (0, C_pad - C))).reshape(1, EC)

    inv_denom = 1.0 / (E * 2.0 * SIGMA ** 2)        # mean over E then /(2*sigma^2)
    rows = jnp.arange(EC)
    sel = jnp.zeros((EC, CLASS_PAD), jnp.float32)
    sel = sel.at[rows, rows % C_pad].set(inv_denom)                      # (EC, 128)

    return {
        "w1_big": w1_big.astype(compute_dtype),
        "b1_big": b1_big,                            # f32 (added to f32 accum)
        "wz": wz.astype(compute_dtype),
        "bz": bz,
        "mu": mu,
        "sel": sel.astype(compute_dtype),
        "centroids": centroids,
        "meta": dict(E=E, C=C, C_pad=C_pad, L=L, F=F, H=H, P=P,
                     compute_dtype=compute_dtype),
    }


# ---------------- wrapper ------------------------------------------------------
def _pick_batch_tile(batch, max_tile=MAX_BATCH_TILE):
    """Batch rows per grid step: big tiles (fill MXU M, amortize step overhead),
    and an even tile count for small batches so both v7x TensorCores get work."""
    b8 = ((batch + 7) // 8) * 8
    if b8 <= 8:
        return 8
    if b8 <= 2 * max_tile:
        return (((b8 + 1) // 2) + 7) // 8 * 8        # two balanced tiles
    return max_tile


def duq_particle_classifier_forward(point_cloud, prepared, *, batch_tile=None):
    """Forward pass of DUQParticleClassifier (eval-mode semantics)."""
    meta = prepared["meta"]
    E, C, C_pad = meta["E"], meta["C"], meta["C_pad"]
    H, P, F = meta["H"], meta["P"], meta["F"]
    EC = E * C_pad

    B, P_in, F_in = point_cloud.shape
    assert P_in == P and F_in == F, "prepare_params() was built for a different P/F"

    TB = batch_tile or _pick_batch_tile(B)
    n_tiles = -(-B // TB)
    B_pad = n_tiles * TB

    # Lane-dense packing: (B, P, F) -> (B, P*F).  In a real pipeline do this
    # once upstream (outside the hot path); the batch pad below touches only
    # the few (< TB) padded rows, never the full point cloud.
    pc2 = point_cloud.reshape(B, P * F)
    if B_pad != B:
        pc2 = jnp.pad(pc2, ((0, B_pad - B), (0, 0)))

    kernel = functools.partial(_fused_kernel, hidden=H, num_points=P,
                               compute_dtype=meta["compute_dtype"])

    z_flat, y_pad = pl.pallas_call(
        kernel,
        out_shape=(jax.ShapeDtypeStruct((B_pad, EC), jnp.float32),
                   jax.ShapeDtypeStruct((B_pad, CLASS_PAD), jnp.float32)),
        grid_spec=pltpu.PrefetchScalarGridSpec(
            num_scalar_prefetch=0,
            grid=(n_tiles,),
            in_specs=[
                pl.BlockSpec((TB, P * F), lambda i: (i, 0)),          # packed points
                pl.BlockSpec((P * F, P * H), lambda i: (0, 0)),       # w1_big
                pl.BlockSpec((1, P * H), lambda i: (0, 0)),           # b1_big
                pl.BlockSpec((H, EC), lambda i: (0, 0)),              # wz (fused)
                pl.BlockSpec((1, EC), lambda i: (0, 0)),              # bz
                pl.BlockSpec((1, EC), lambda i: (0, 0)),              # mu
                pl.BlockSpec((EC, CLASS_PAD), lambda i: (0, 0)),      # selector
            ],
            out_specs=(pl.BlockSpec((TB, EC), lambda i: (i, 0)),
                       pl.BlockSpec((TB, CLASS_PAD), lambda i: (i, 0))),
        ),
        compiler_params=pltpu.CompilerParams(
            dimension_semantics=("parallel",),      # batch tiles across TCs on v7x
            vmem_limit_bytes=40 * 1024 * 1024,      # <= ~40 MiB: safe on v5e/v6e/v7x
        ),
    )(pc2, prepared["w1_big"], prepared["b1_big"], prepared["wz"],
      prepared["bz"], prepared["mu"], prepared["sel"])

    # drop batch padding, class padding and lane padding
    z = z_flat[:B].reshape(B, E, C_pad)[:, :, :C]                 # embedding 'imn'
    y_pred = y_pad[:B, :C]                                        # never use cols >= C
    res = {
        "score": [y_pred],
        "embedding": [z],
        "input": [point_cloud],
        "centroids": [prepared["centroids"]],
    }
    return res


# ---------------- deterministic parameter init --------------------------------
def init_params(key):
    k_w, k_m, k_w1, k_b1, k_w2, k_b2 = jax.random.split(key, 6)

    # w: (E, C, L), kaiming_normal_ (fan_in = C * L, relu gain)
    fan_in = NUM_CLASSES * LATENT_SIZE
    std = (2.0 / fan_in) ** 0.5
    w = std * jax.random.normal(k_w, (EMBEDDING_DIM, NUM_CLASSES, LATENT_SIZE),
                                dtype=jnp.float32)

    # buffers: N = 20 * ones(C); m = Normal(0, 0.05) * N  (as in __init__)
    N = 20.0 * jnp.ones((NUM_CLASSES,), dtype=jnp.float32)
    m = 0.05 * jax.random.normal(k_m, (EMBEDDING_DIM, NUM_CLASSES),
                                 dtype=jnp.float32) * N[None, :]

    # surrogate encoder weights
    enc_w1 = 0.1 * jax.random.normal(k_w1, (POINT_FEATS, HIDDEN), jnp.float32)
    enc_b1 = 0.1 * jax.random.normal(k_b1, (1, HIDDEN), jnp.float32)
    enc_w2 = 0.1 * jax.random.normal(k_w2, (HIDDEN, LATENT_SIZE), jnp.float32)
    enc_b2 = 0.1 * jax.random.normal(k_b2, (1, LATENT_SIZE), jnp.float32)

    return {"w": w, "N": N, "m": m,
            "enc_w1": enc_w1, "enc_b1": enc_b1,
            "enc_w2": enc_w2, "enc_b2": enc_b2}


# ---------------- pure-JAX reference (sanity check, f32, unfused) -------------
def _reference_forward(point_cloud, params):
    h = jnp.einsum("bpf,fh->bph", point_cloud, params["enc_w1"]) + params["enc_b1"][None]
    h = jnp.maximum(h, 0.0)
    feats = jnp.max(h, axis=1) @ params["enc_w2"] + params["enc_b2"]
    z = jnp.einsum("ij,mnj->imn", feats, params["w"])
    centroids = params["m"] / params["N"][None, :]
    diff = z - centroids[None]
    y = jnp.exp(jnp.mean(-diff ** 2, axis=1) / (2.0 * SIGMA ** 2))
    return z, y


if __name__ == "__main__":
    key = jax.random.PRNGKey(0)
    k_params, k_pc = jax.random.split(key)

    params = init_params(k_params)

    # small but non-trivial: exercises two grid steps and the batch-padding path
    B, P = 12, 32
    prepared = prepare_params(params, num_points=P)
    point_cloud = jax.random.normal(k_pc, (B, P, POINT_FEATS), dtype=jnp.float32)

    res = duq_particle_classifier_forward(point_cloud, prepared)
    y_pred = jax.block_until_ready(res["score"][0])
    z = jax.block_until_ready(res["embedding"][0])

    # sanity check vs. plain-JAX f32 reference (bf16 MXU operands + weight
    # fusion change FP association slightly -> loosened tolerance)
    z_ref, y_ref = _reference_forward(point_cloud, params)
    assert z.shape == (B, EMBEDDING_DIM, NUM_CLASSES)
    assert y_pred.shape == (B, NUM_CLASSES)
    assert jnp.allclose(z, z_ref, atol=5e-2, rtol=5e-2)
    assert jnp.allclose(y_pred, y_ref, atol=5e-2, rtol=5e-2)

    print("KERNEL_OK")
</pallas_src>

<mosaic_0001>
module attributes {stable_mosaic.version = 11 : i64} {
  func.func @_fused_kernel(%arg0: i32, %arg1: memref<8x128xf32, #tpu.memory_space<vmem>>, %arg2: memref<128x4096xbf16, #tpu.memory_space<vmem>>, %arg3: memref<1x4096xf32, #tpu.memory_space<vmem>>, %arg4: memref<128x384xbf16, #tpu.memory_space<vmem>>, %arg5: memref<1x384xf32, #tpu.memory_space<vmem>>, %arg6: memref<1x384xf32, #tpu.memory_space<vmem>>, %arg7: memref<384x128xbf16, #tpu.memory_space<vmem>>, %arg8: memref<8x384xf32, #tpu.memory_space<vmem>>, %arg9: memref<8x128xf32, #tpu.memory_space<vmem>>) attributes {dimension_semantics = [#tpu.dimension_semantics<parallel>], iteration_bounds = array<i64: 2>, scalar_prefetch = 0 : i64, scratch_operands = 0 : i64, tpu.core_type = #tpu.core_type<tc>, window_params = [{transform_indices = @transform_0, window_bounds = array<i64: 8, 128>}, {pipeline_mode = #tpu.pipeline_mode<synchronous>, transform_indices = @transform_1, window_bounds = array<i64: 128, 4096>}, {pipeline_mode = #tpu.pipeline_mode<synchronous>, transform_indices = @transform_2, window_bounds = array<i64: 1, 4096>}, {pipeline_mode = #tpu.pipeline_mode<synchronous>, transform_indices = @transform_3, window_bounds = array<i64: 128, 384>}, {pipeline_mode = #tpu.pipeline_mode<synchronous>, transform_indices = @transform_4, window_bounds = array<i64: 1, 384>}, {pipeline_mode = #tpu.pipeline_mode<synchronous>, transform_indices = @transform_5, window_bounds = array<i64: 1, 384>}, {pipeline_mode = #tpu.pipeline_mode<synchronous>, transform_indices = @transform_6, window_bounds = array<i64: 384, 128>}, {transform_indices = @transform_7, window_bounds = array<i64: 8, 384>}, {transform_indices = @transform_8, window_bounds = array<i64: 8, 128>}]} {
    %c0 = arith.constant 0 : index
    %c0_0 = arith.constant 0 : index
    %0 = vector.load %arg1[%c0, %c0_0] : memref<8x128xf32, #tpu.memory_space<vmem>>, vector<8x128xf32>
    %1 = arith.truncf %0 : vector<8x128xf32> to vector<8x128xbf16>
    %c0_1 = arith.constant 0 : index
    %c0_2 = arith.constant 0 : index
    %2 = vector.load %arg2[%c0_1, %c0_2] : memref<128x4096xbf16, #tpu.memory_space<vmem>>, vector<128x4096xbf16>
    %cst = arith.constant dense<0.000000e+00> : vector<8x4096xf32>
    %3 = tpu.matmul %1, %2, %cst {dimension_numbers = #tpu.dot_dimension_numbers<[1], [0], [0], [1], [0, 0, 1, 1], [], []>} : vector<8x128xbf16>, vector<128x4096xbf16>, vector<8x4096xf32> -> vector<8x4096xf32>
    %c0_3 = arith.constant 0 : index
    %c0_4 = arith.constant 0 : index
    %4 = vector.load %arg3[%c0_3, %c0_4] : memref<1x4096xf32, #tpu.memory_space<vmem>>, vector<1x4096xf32>
    %5 = vector.broadcast %4 : vector<1x4096xf32> to vector<8x4096xf32>
    %6 = arith.addf %3, %5 : vector<8x4096xf32>
    %cst_5 = arith.constant 0.000000e+00 : f32
    %7 = vector.broadcast %cst_5 : f32 to vector<8x4096xf32>
    %8 = arith.maximumf %6, %7 : vector<8x4096xf32>
    %9 = vector.extract_strided_slice %8 {offsets = [0, 0], sizes = [8, 128], strides = [1, 1]} : vector<8x4096xf32> to vector<8x128xf32>
    %10 = vector.extract_strided_slice %8 {offsets = [0, 128], sizes = [8, 128], strides = [1, 1]} : vector<8x4096xf32> to vector<8x128xf32>
    %11 = arith.maximumf %9, %10 : vector<8x128xf32>
    %12 = vector.extract_strided_slice %8 {offsets = [0, 256], sizes = [8, 128], strides = [1, 1]} : vector<8x4096xf32> to vector<8x128xf32>
    %13 = arith.maximumf %11, %12 : vector<8x128xf32>
    %14 = vector.extract_strided_slice %8 {offsets = [0, 384], sizes = [8, 128], strides = [1, 1]} : vector<8x4096xf32> to vector<8x128xf32>
    %15 = arith.maximumf %13, %14 : vector<8x128xf32>
    %16 = vector.extract_strided_slice %8 {offsets = [0, 512], sizes = [8, 128], strides = [1, 1]} : vector<8x4096xf32> to vector<8x128xf32>
    %17 = arith.maximumf %15, %16 : vector<8x128xf32>
    %18 = vector.extract_strided_slice %8 {offsets = [0, 640], sizes = [8, 128], strides = [1, 1]} : vector<8x4096xf32> to vector<8x128xf32>
    %19 = arith.maximumf %17, %18 : vector<8x128xf32>
    %20 = vector.extract_strided_slice %8 {offsets = [0, 768], sizes = [8, 128], strides = [1, 1]} : vector<8x4096xf32> to vector<8x128xf32>
    %21 = arith.maximumf %19, %20 : vector<8x128xf32>
    %22 = vector.extract_strided_slice %8 {offsets = [0, 896], sizes = [8, 128], strides = [1, 1]} : vector<8x4096xf32> to vector<8x128xf32>
    %23 = arith.maximumf %21, %22 : vector<8x128xf32>
    %24 = vector.extract_strided_slice %8 {offsets = [0, 1024], sizes = [8, 128], strides = [1, 1]} : vector<8x4096xf32> to vector<8x128xf32>
    %25 = arith.maximumf %23, %24 : vector<8x128xf32>
    %26 = vector.extract_strided_slice %8 {offsets = [0, 1152], sizes = [8, 128], strides = [1, 1]} : vector<8x4096xf32> to vector<8x128xf32>
    %27 = arith.maximumf %25, %26 : vector<8x128xf32>
    %28 = vector.extract_strided_slice %8 {offsets = [0, 1280], sizes = [8, 128], strides = [1, 1]} : vector<8x4096xf32> to vector<8x128xf32>
    %29 = arith.maximumf %27, %28 : vector<8x128xf32>
    %30 = vector.extract_strided_slice %8 {offsets = [0, 1408], sizes = [8, 128], strides = [1, 1]} : vector<8x4096xf32> to vector<8x128xf32>
    %31 = arith.maximumf %29, %30 : vector<8x128xf32>
    %32 = vector.extract_strided_slice %8 {offsets = [0, 1536], sizes = [8, 128], strides = [1, 1]} : vector<8x4096xf32> to vector<8x128xf32>
    %33 = arith.maximumf %31, %32 : vector<8x128xf32>
    %34 = vector.extract_strided_slice %8 {offsets = [0, 1664], sizes = [8, 128], strides = [1, 1]} : vector<8x4096xf32> to vector<8x128xf32>
    %35 = arith.maximumf %33, %34 : vector<8x128xf32>
    %36 = vector.extract_strided_slice %8 {offsets = [0, 1792], sizes = [8, 128], strides = [1, 1]} : vector<8x4096xf32> to vector<8x128xf32>
    %37 = arith.maximumf %35, %36 : vector<8x128xf32>
    %38 = vector.extract_strided_slice %8 {offsets = [0, 1920], sizes = [8, 128], strides = [1, 1]} : vector<8x4096xf32> to vector<8x128xf32>
    %39 = arith.maximumf %37, %38 : vector<8x128xf32>
    %40 = vector.extract_strided_slice %8 {offsets = [0, 2048], sizes = [8, 128], strides = [1, 1]} : vector<8x4096xf32> to vector<8x128xf32>
    %41 = arith.maximumf %39, %40 : vector<8x128xf32>
    %42 = vector.extract_strided_slice %8 {offsets = [0, 2176], sizes = [8, 128], strides = [1, 1]} : vector<8x4096xf32> to vector<8x128xf32>
    %43 = arith.maximumf %41, %42 : vector<8x128xf32>
    %44 = vector.extract_strided_slice %8 {offsets = [0, 2304], sizes = [8, 128], strides = [1, 1]} : vector<8x4096xf32> to vector<8x128xf32>
    %45 = arith.maximumf %43, %44 : vector<8x128xf32>
    %46 = vector.extract_strided_slice %8 {offsets = [0, 2432], sizes = [8, 128], strides = [1, 1]} : vector<8x4096xf32> to vector<8x128xf32>
    %47 = arith.maximumf %45, %46 : vector<8x128xf32>
    %48 = vector.extract_strided_slice %8 {offsets = [0, 2560], sizes = [8, 128], strides = [1, 1]} : vector<8x4096xf32> to vector<8x128xf32>
    %49 = arith.maximumf %47, %48 : vector<8x128xf32>
    %50 = vector.extract_strided_slice %8 {offsets = [0, 2688], sizes = [8, 128], strides = [1, 1]} : vector<8x4096xf32> to vector<8x128xf32>
    %51 = arith.maximumf %49, %50 : vector<8x128xf32>
    %52 = vector.extract_strided_slice %8 {offsets = [0, 2816], sizes = [8, 128], strides = [1, 1]} : vector<8x4096xf32> to vector<8x128xf32>
    %53 = arith.maximumf %51, %52 : vector<8x128xf32>
    %54 = vector.extract_strided_slice %8 {offsets = [0, 2944], sizes = [8, 128], strides = [1, 1]} : vector<8x4096xf32> to vector<8x128xf32>
    %55 = arith.maximumf %53, %54 : vector<8x128xf32>
    %56 = vector.extract_strided_slice %8 {offsets = [0, 3072], sizes = [8, 128], strides = [1, 1]} : vector<8x4096xf32> to vector<8x128xf32>
    %57 = arith.maximumf %55, %56 : vector<8x128xf32>
    %58 = vector.extract_strided_slice %8 {offsets = [0, 3200], sizes = [8, 128], strides = [1, 1]} : vector<8x4096xf32> to vector<8x128xf32>
    %59 = arith.maximumf %57, %58 : vector<8x128xf32>
    %60 = vector.extract_strided_slice %8 {offsets = [0, 3328], sizes = [8, 128], strides = [1, 1]} : vector<8x4096xf32> to vector<8x128xf32>
    %61 = arith.maximumf %59, %60 : vector<8x128xf32>
    %62 = vector.extract_strided_slice %8 {offsets = [0, 3456], sizes = [8, 128], strides = [1, 1]} : vector<8x4096xf32> to vector<8x128xf32>
    %63 = arith.maximumf %61, %62 : vector<8x128xf32>
    %64 = vector.extract_strided_slice %8 {offsets = [0, 3584], sizes = [8, 128], strides = [1, 1]} : vector<8x4096xf32> to vector<8x128xf32>
    %65 = arith.maximumf %63, %64 : vector<8x128xf32>
    %66 = vector.extract_strided_slice %8 {offsets = [0, 3712], sizes = [8, 128], strides = [1, 1]} : vector<8x4096xf32> to vector<8x128xf32>
    %67 = arith.maximumf %65, %66 : vector<8x128xf32>
    %68 = vector.extract_strided_slice %8 {offsets = [0, 3840], sizes = [8, 128], strides = [1, 1]} : vector<8x4096xf32> to vector<8x128xf32>
    %69 = arith.maximumf %67, %68 : vector<8x128xf32>
    %70 = vector.extract_strided_slice %8 {offsets = [0, 3968], sizes = [8, 128], strides = [1, 1]} : vector<8x4096xf32> to vector<8x128xf32>
    %71 = arith.maximumf %69, %70 : vector<8x128xf32>
    %72 = arith.truncf %71 : vector<8x128xf32> to vector<8x128xbf16>
    %c0_6 = arith.constant 0 : index
    %c0_7 = arith.constant 0 : index
    %73 = vector.load %arg4[%c0_6, %c0_7] : memref<128x384xbf16, #tpu.memory_space<vmem>>, vector<128x384xbf16>
    %cst_8 = arith.constant dense<0.000000e+00> : vector<8x384xf32>
    %74 = tpu.matmul %72, %73, %cst_8 {dimension_numbers = #tpu.dot_dimension_numbers<[1], [0], [0], [1], [0, 0, 1, 1], [], []>} : vector<8x128xbf16>, vector<128x384xbf16>, vector<8x384xf32> -> vector<8x384xf32>
    %c0_9 = arith.constant 0 : index
    %c0_10 = arith.constant 0 : index
    %75 = vector.load %arg5[%c0_9, %c0_10] : memref<1x384xf32, #tpu.memory_space<vmem>>, vector<1x384xf32>
    %76 = vector.broadcast %75 : vector<1x384xf32> to vector<8x384xf32>
    %77 = arith.addf %74, %76 : vector<8x384xf32>
    %c0_11 = arith.constant 0 : index
    %c0_12 = arith.constant 0 : index
    %78 = vector.load %arg8[%c0_11, %c0_12] : memref<8x384xf32, #tpu.memory_space<vmem>>, vector<8x384xf32>
    tpu.vector_store %arg8[%c0_11, %c0_12], %77 {strides = array<i32>} : memref<8x384xf32, #tpu.memory_space<vmem>>, vector<8x384xf32>,
    %c0_13 = arith.constant 0 : index
    %c0_14 = arith.constant 0 : index
    %79 = vector.load %arg6[%c0_13, %c0_14] : memref<1x384xf32, #tpu.memory_space<vmem>>, vector<1x384xf32>
    %80 = vector.broadcast %79 : vector<1x384xf32> to vector<8x384xf32>
    %81 = arith.subf %77, %80 : vector<8x384xf32>
    %82 = arith.mulf %81, %81 : vector<8x384xf32>
    %83 = arith.truncf %82 : vector<8x384xf32> to vector<8x384xbf16>
    %c0_15 = arith.constant 0 : index
    %c0_16 = arith.constant 0 : index
    %84 = vector.load %arg7[%c0_15, %c0_16] : memref<384x128xbf16, #tpu.memory_space<vmem>>, vector<384x128xbf16>
    %cst_17 = arith.constant dense<0.000000e+00> : vector<8x128xf32>
    %85 = tpu.matmul %83, %84, %cst_17 {dimension_numbers = #tpu.dot_dimension_numbers<[1], [0], [0], [1], [0, 0, 1, 1], [], []>} : vector<8x384xbf16>, vector<384x128xbf16>, vector<8x128xf32> -> vector<8x128xf32>
    %cst_18 = arith.constant 0.000000e+00 : f32
    %86 = vector.broadcast %cst_18 : f32 to vector<8x128xf32>
    %87 = arith.subf %86, %85 : vector<8x128xf32>
    %88 = math.exp %87 : vector<8x128xf32>
    %c0_19 = arith.constant 0 : index
    %c0_20 = arith.constant 0 : index
    %89 = vector.load %arg9[%c0_19, %c0_20] : memref<8x128xf32, #tpu.memory_space<vmem>>, vector<8x128xf32>
    tpu.vector_store %arg9[%c0_19, %c0_20], %88 {strides = array<i32>} : memref<8x128xf32, #tpu.memory_space<vmem>>, vector<8x128xf32>,
    return
  }
  func.func @transform_0(%arg0: i32) -> (i32, i32) {
    %c0_i32 = arith.constant 0 : i32
    %c0_i32_0 = arith.constant 0 : i32
    return %arg0, %c0_i32 : i32, i32
  }
  func.func @transform_1(%arg0: i32) -> (i32, i32) {
    %c0_i32 = arith.constant 0 : i32
    %c0_i32_0 = arith.constant 0 : i32
    %c0_i32_1 = arith.constant 0 : i32
    return %c0_i32, %c0_i32_0 : i32, i32
  }
  func.func @transform_2(%arg0: i32) -> (i32, i32) {
    %c0_i32 = arith.constant 0 : i32
    %c0_i32_0 = arith.constant 0 : i32
    %c0_i32_1 = arith.constant 0 : i32
    return %c0_i32, %c0_i32_0 : i32, i32
  }
  func.func @transform_3(%arg0: i32) -> (i32, i32) {
    %c0_i32 = arith.constant 0 : i32
    %c0_i32_0 = arith.constant 0 : i32
    %c0_i32_1 = arith.constant 0 : i32
    return %c0_i32, %c0_i32_0 : i32, i32
  }
  func.func @transform_4(%arg0: i32) -> (i32, i32) {
    %c0_i32 = arith.constant 0 : i32
    %c0_i32_0 = arith.constant 0 : i32
    %c0_i32_1 = arith.constant 0 : i32
    return %c0_i32, %c0_i32_0 : i32, i32
  }
  func.func @transform_5(%arg0: i32) -> (i32, i32) {
    %c0_i32 = arith.constant 0 : i32
    %c0_i32_0 = arith.constant 0 : i32
    %c0_i32_1 = arith.constant 0 : i32
    return %c0_i32, %c0_i32_0 : i32, i32
  }
  func.func @transform_6(%arg0: i32) -> (i32, i32) {
    %c0_i32 = arith.constant 0 : i32
    %c0_i32_0 = arith.constant 0 : i32
    %c0_i32_1 = arith.constant 0 : i32
    return %c0_i32, %c0_i32_0 : i32, i32
  }
  func.func @transform_7(%arg0: i32) -> (i32, i32) {
    %c0_i32 = arith.constant 0 : i32
    %c0_i32_0 = arith.constant 0 : i32
    return %arg0, %c0_i32 : i32, i32
  }
  func.func @transform_8(%arg0: i32) -> (i32, i32) {
    %c0_i32 = arith.constant 0 : i32
    %c0_i32_0 = arith.constant 0 : i32
    return %arg0, %c0_i32 : i32, i32
  }
}

</mosaic_0001>

<bundles_post_ra>
// kernel: tpu_custom_call.1
= control target key start
LH: loop header
LB: loop body
LE: loop exit
PB: predicated region body
PF: predicated region fallthrough
CT: control target
= control target key end

     0   :  { %s5449_s0 = inlined_call_operand.hbm [shape: f32[16,128], index: 0, kind: input, shape index: {}]   ;;  %s5450_s1 = inlined_call_operand.hbm [shape: bf16[128,4096], index: 1, kind: input, shape index: {}]   ;;  %s5451_s2 = inlined_call_operand.hbm [shape: f32[1,4096], index: 2, kind: input, shape index: {}]   ;;  %s5452_s3 = inlined_call_operand.hbm [shape: bf16[128,384], index: 3, kind: input, shape index: {}]   ;;  %s5453_s4 = inlined_call_operand.vmem [shape: f32[1,384], index: 4, kind: input, shape index: {}]   ;;  %s5454_s5 = inlined_call_operand.hbm [shape: f32[1,384], index: 5, kind: input, shape index: {}]   ;;  %s5455_s6 = inlined_call_operand.hbm [shape: bf16[384,128], index: 6, kind: input, shape index: {}]   ;;  %s5456_s7 = inlined_call_operand.hbm [shape: f32[16,384], index: 7, kind: output, shape index: {0}]   ;;  %s5457_s8 = inlined_call_operand.hbm [shape: f32[16,128], index: 8, kind: output, shape index: {1}]  }
   0x1   :  { %5459 = sst [smem:[#allocation22_spill]] %s5450_s1 }
   0x2   :  { %5460 = sst [smem:[#allocation23_spill]] %s5451_s2 }
   0x3   :  { %14 = vsyncpa [#allocation3], 0 }
   0x4   :  { %16 = vsyncpa [#allocation3 + $0x1], 0 }
   0x5   :  { %17 = vsyncpa [#allocation6], 0 }
   0x6   :  { %18 = vsyncpa [#allocation9], 0 }
   0x7   :  { %19 = vsyncpa [#allocation12], 0 }
   0x8   :  { %20 = vsyncpa [#allocation4], 0 }
   0x9   :  { %22 = vsyncpa [#allocation4 + $0x1], 0 }
   0xa   :  { %23 = vsyncpa [#allocation15], 0 }
   0xb   :  { %25 = vsyncpa [#allocation15 + $0x1], 0  ;;  %s5155_s27 = smov 0   ;;  %s5157_s28 = smov 0  }
   0xc   :  { %s5159_s29 = smov 0   ;;  %s5161_s30 = smov 0  }
   0xd LB: > { %s5461_s1 = sld [smem:[#allocation22_spill]]  ;;  %s5179_s12 = sadd.s32 4294967295, %s5097_s30   ;;  %s5097_s30 = sphi %s5161_s30, %s5474_s30   ;;  %s5093_s29 = sphi %s5159_s29, %s5473_s29   ;;  %s5089_s28 = sphi %s5157_s28, %s5472_s28   ;;  %s5085_s27 = sphi %s5155_s27, %s5471_s27  }
   0xe   : > { %p3153_p0 = scmp.ge.s32.totalorder %s5097_s30, 1  ;;  %p52_p1 = scmp.eq.s32.totalorder %s5179_s12, 0 }
   0xf   : > { %p240_p2 = scmp.lt.s32.totalorder %s5097_s30, 3  ;;  %s5099_s14 = smov [#allocation5]  }
  0x10   : > { %s253_s15 = sshll.u32 %s5099_s14, 4  ;;  %s277_s18 = sshll.u32 %s5452_s3, 4  ;;  %s254_s15 = int_to_ptr.vmem [resolvable:$true] %s253_s15  ;;  %s278_s18 = int_to_ptr.hbm [resolvable:$true] %s277_s18 }
  0x11   : > { %p5184_p3 = pnand %p3153_p0, %p240_p2  ;;  %s5100_s20 = smov [#allocation8]  }
  0x12   : > { %s279_s21 = sshll.u32 %s5100_s20, 4  ;;  %s5101_s22 = smov 2048   ;;  %s280_s21 = int_to_ptr.vmem [resolvable:$true] %s279_s21 }
  0x13   : > { %s251_s11 = sshll.u32 %s5461_s1, 4  ;;  %p4723_p4 = pneg %p5184_p3  ;;  %s252_s11 = int_to_ptr.hbm [resolvable:$true] %s251_s11 }
  0x14   : > { %s5102_s23 = smov 128   ;;  %s5103_s24 = smov 192  }
  0x15   : > { %p5196_p6 = pnand %p4723_p4, %p52_p1  ;;  %s5104_s25 = smov 12  }
  0x16   : > { %s5464_s2 = sld [smem:[#allocation23_spill]]  ;;  %s5105_s14 = smov [#allocation7]  }
  0x17   : > { %4726 = dma.hbm_to_vmem [thread:$0]  (!%p5196_p6), %s252_s11, 32768, %s254_s15, [#allocation6], %s5101_s22, %s5101_s22, %s5102_s23  }
  0x18   : > { %4732 = dma.hbm_to_vmem [thread:$0]  (!%p5196_p6), %s278_s18, 3072, %s280_s21, [#allocation9], %s5103_s24, %s5103_s24, %s5104_s25  }
  0x19   : > { %s268_s16 = sshll.u32 %s5105_s14, 4  ;;  %s295_s11 = sshll.u32 %s5454_s5, 4  ;;  %s269_s16 = int_to_ptr.vmem [resolvable:$true] %s268_s16  ;;  %s296_s11 = int_to_ptr.hbm [resolvable:$true] %s295_s11 }
  0x1a   : > { %s5106_s15 = smov [#allocation10]   ;;  %s306_s23 = sshll.u32 %s5455_s6, 4  ;;  %s307_s23 = int_to_ptr.hbm [resolvable:$true] %s306_s23 }
  0x1b   : > { %s297_s18 = sshll.u32 %s5106_s15, 4  ;;  %s5107_s24 = smov [#allocation11]   ;;  %s298_s18 = int_to_ptr.vmem [resolvable:$true] %s297_s18 }
  0x1c   : > { %s266_s10 = sshll.u32 %s5464_s2, 4  ;;  %s308_s25 = sshll.u32 %s5107_s24, 4  ;;  %s267_s10 = int_to_ptr.hbm [resolvable:$true] %s266_s10  ;;  %s309_s25 = int_to_ptr.vmem [resolvable:$true] %s308_s25 }
  0x1d   : > { %4729 = dma.hbm_to_vmem [thread:$0]  (!%p5196_p6), %s267_s10, 512, %s269_s16, [#allocation6]  }
  0x1e   : > { %4735 = dma.hbm_to_vmem [thread:$0]  (!%p5196_p6), %s296_s11, 48, %s298_s18, [#allocation9]  }
  0x1f   : > { %s5108_s26 = smov 64   ;;  %s5109_s9 = smov 4  }
  0x20   : > { %4738 = dma.hbm_to_vmem [thread:$0]  (!%p5196_p6), %s307_s23, 3072, %s309_s25, [#allocation12], %s5108_s26, %s5108_s26, %s5109_s9  }
  0x21   : > { %s3152_s10 = sadd.s32 4294967294, %s5097_s30   ;;  %s5221_s14 = sadd.s32 1, %s5097_s30  }
  0x22   : > { %s38_s16 = sadd.s32 1, %s5093_s29  ;;  %s35_s17 = ssub.s32 %s5097_s30, %s5221_s14 }
  0x23   : > { %p45_p7 = scmp.ne.s32.totalorder %s5093_s29, %s5089_s28  ;;  %p36_p8 = scmp.eq.s32.totalorder %s35_s17, 0 }
  0x24   : > { %p46_p9 = scmp.eq.s32.totalorder %s5097_s30, 0  ;;  %p51_p10 = scmp.ne.s32.totalorder %s5089_s28, %s5085_s27 }
  0x25   : > { %p201_p11 = scmp.eq.s32.totalorder %s5179_s12, 1  ;;  %p207_p0 = scmp.eq.s32.totalorder %s3152_s10, 1 }
  0x26   : > { %s5233_s20 = scalar_select %p36_p8, %s5093_s29, %s38_s16  }
  0x27   : > { %p5237_p12 = por %p52_p1, %p51_p10  ;;  %p5241_p13 = por %p201_p11, %p45_p7 }
  0x28   : > { %p47_p2 = por %p46_p9, %p45_p7  ;;  %s322_s15 = sand.u32 1, %s5093_s29  }
  0x29   : > { %p5246_p4 = por %p207_p0, %p51_p10  ;;  %p4755_p6 = scmp.lt.s32.totalorder %s5097_s30, 2 }
  0x2a   : > { %s3160_s21 = sshll.u32 %s322_s15, 3  ;;  %s3161_s22 = sshll.u32 %s5097_s30, 3 }
  0x2b   : > { %s330_s25 = scalar_lea.hbm %s5449_s0, %s3161_s22  ;;  %s326_s9 = scalar_lea.vmem [#allocation2], %s3160_s21 }
  0x2c   : > { %s332_s26 = sshll.u32 %s330_s25, 4  ;;  %s334_s16 = sshll.u32 %s326_s9, 4  ;;  %s333_s26 = int_to_ptr.hbm [resolvable:$true] %s332_s26  ;;  %s335_s16 = int_to_ptr.vmem [resolvable:$true] %s334_s16 }
  0x2d   : > { %p5255_p8 = pnand %p4755_p6, %p47_p2  ;;  %s323_s17 = scalar_lea.sflag [#allocation3], %s322_s15 }
  0x2e   : > { %s4957_s1 = sshra.s32 %s333_s26, 4  ;;  %s4964_s21 = scalar_lea.hbm %s5449_s0, 16  ;;  %s4958_s1 = int_to_ptr.hbm [resolvable:$true] %s4957_s1 }
  0x2f   : > { %s4959_s2 = scalar_lea.hbm %s4958_s1, 8  ;;  %p4961_p9 = pneg %p5255_p8 }
  0x30   : > { %p4960_p7 = scmp.ne.s32.totalorder %s4958_s1, %s4959_s2  ;;  %p4965_p0 = scmp.lt.s32.totalorder %s4958_s1, %s5449_s0 }
  0x31   : > { %p4966_p2 = scmp.lt.s32.totalorder %s4964_s21, %s4959_s2 }
  0x32   : > { %p4962_p10 = pnand %p4961_p9, %p4960_p7 }
  0x33   : > { %p4967_p6 = por %p4966_p2, %p4965_p0 }
  0x34   : > { %p4963_p11 = pneg %p4962_p10 }
  0x36   : > { %p4968_p5 = pnand %p4967_p6, %p4963_p11 }
  0x38   : > { %4971 = shalt.err (!%p4968_p5)
}
  0x39   : > { %4742 = dma.hbm_to_vmem [thread:$0]  (!%p5255_p8), %s333_s26, 128, %s335_s16, %s323_s17  }
  0x3a   : > { %343 = sbr.rel (%p5184_p3) target bundleno = 756 (0x2f4), region = 48  ;;  %s5272_s15 = sand.u32 (!%p5184_p3), 1, %s5089_s28  }
  0x3b   : > { %s5458_s9 = sshll.u32 (!%p5184_p3), %s5272_s15, 3  ;;  %s346_s22 = scalar_lea.sflag (!%p5184_p3), [#allocation3], %s5272_s15 }
  0x3c   : > { %s5278_s1 = scalar_lea.vmem (!%p5184_p3), [#allocation2], %s5458_s9 }
  0x3f   : > { %5060 = dma.done.wait (%p5237_p12), %s346_s22, 128  }
  0x40   : > { %5062 = vsyncadd (%p5237_p12), %s346_s22, 4294967168 }
  0x41   : > { %5064 = dma.done.wait (%p52_p1), [#allocation6], 33280  }
  0x42   : > { %5066 = vsyncadd (%p52_p1), [#allocation6], 4294934016 }
  0x43   : > { %5068 = dma.done.wait (%p52_p1), [#allocation9], 3120  }
  0x44   : > { %5070 = vsyncadd (%p52_p1), [#allocation9], 4294964176 }
  0x45   : > { %5072 = dma.done.wait (%p52_p1), [#allocation12], 3072  }
  0x46   : > { %5074 = vsyncadd (%p52_p1), [#allocation12], 4294964224  ;;  %v4068_v0 = vld [vmem:[#allocation5 + $0x700] sm:$0xf]  ;;  %v4615_v2 = vld [vmem:[#allocation5 + $0x704] sm:$0xf] }
  0x47   : > { %v4631_v1 = vld [vmem:[#allocation5 + $0x77c] sm:$0xf0]  ;;  %v4070_v4 = vld [vmem:[#allocation5 + $0x780] sm:$0xf0]  ;;  %v4076_v5 = vld [vmem:[#allocation5 + $0x708] sm:$0xf] }
  0x48   : > { %v4069_v3 = vor.u32 %v4631_v1, %v4068_v0  ;;  %v4632_v6 = vld [vmem:[#allocation5 + $0x784] sm:$0xf0]  ;;  %v4073_v7 = vor.u32 %v4615_v2, %v4070_v4  ;;  %v4616_v9 = vld [vmem:[#allocation5 + $0x70c] sm:$0xf]  ;;  %v3940_v11 = vld [vmem:[#allocation5 + $0x600] sm:$0xf] }
  0x49   : > { %v4077_v8 = vor.u32 %v4632_v6, %v4076_v5  ;;  %v4078_v10 = vld [vmem:[#allocation5 + $0x788] sm:$0xf0]  ;;  %v4599_v13 = vld [vmem:[#allocation5 + $0x67c] sm:$0xf0]  ;;  %v4583_v14 = vld [vmem:[#allocation5 + $0x604] sm:$0xf] }
  0x4a   : > { %2023 = vmatpush.bf16.msra.mxu0 %v4069_v3  ;;  %v4081_v12 = vor.u32 %v4616_v9, %v4078_v10  ;;  %v3942_v15 = vld [vmem:[#allocation5 + $0x680] sm:$0xf0]  ;;  %2036 = vmatpush.bf16.msra.mxu1 %v4073_v7  ;;  %v3941_v16 = vor.u32 %v4599_v13, %v3940_v11  ;;  %v3948_v18 = vld [vmem:[#allocation5 + $0x608] sm:$0xf]  ;;  %v4584_v20 = vld [vmem:[#allocation5 + $0x60c] sm:$0xf] }
  0x4b   : > { %2049 = vmatpush.bf16.msra.mxu2 %v4077_v8  ;;  %v3945_v17 = vor.u32 %v4583_v14, %v3942_v15  ;;  %v4600_v19 = vld [vmem:[#allocation5 + $0x684] sm:$0xf0]  ;;  %v3950_v22 = vld [vmem:[#allocation5 + $0x688] sm:$0xf0]  ;;  %v3812_v23 = vld [vmem:[#allocation5 + $0x500] sm:$0xf] }
  0x4c   : > { %2062 = vmatpush.bf16.msra.mxu3 %v4081_v12  ;;  %v3949_v21 = vor.u32 %v4600_v19, %v3948_v18  ;;  %v4567_v24 = vld [vmem:[#allocation5 + $0x57c] sm:$0xf0]  ;;  %v3953_v25 = vor.u32 %v4584_v20, %v3950_v22  ;;  %v4551_v26 = vld [vmem:[#allocation5 + $0x504] sm:$0xf]  ;;  %v3820_v28 = vld [vmem:[#allocation5 + $0x508] sm:$0xf] }
  0x4d   : > { %v3814_v27 = vld [vmem:[#allocation5 + $0x580] sm:$0xf0]  ;;  %v3813_v29 = vor.u32 %v4567_v24, %v3812_v23  ;;  %v4568_v30 = vld [vmem:[#allocation5 + $0x584] sm:$0xf0]  ;;  %v4552_v31 = vld [vmem:[#allocation5 + $0x50c] sm:$0xf] }
  0x4e   : > { %2024 = vmatpush.bf16.msra.mxu0 %v3941_v16  ;;  %v3822_v32 = vld [vmem:[#allocation5 + $0x588] sm:$0xf0]  ;;  %2037 = vmatpush.bf16.msra.mxu1 %v3945_v17  ;;  %v3817_v33 = vor.u32 %v4551_v26, %v3814_v27  ;;  %v3821_v34 = vor.u32 %v4568_v30, %v3820_v28  ;;  %v3684_v35 = vld [vmem:[#allocation5 + $0x400] sm:$0xf]  ;;  %v4519_v37 = vld [vmem:[#allocation5 + $0x404] sm:$0xf] }
  0x4f   : > { %2050 = vmatpush.bf16.msra.mxu2 %v3949_v21  ;;  %v4535_v36 = vld [vmem:[#allocation5 + $0x47c] sm:$0xf0]  ;;  %v3825_v38 = vor.u32 %v4552_v31, %v3822_v32  ;;  %v3686_v39 = vld [vmem:[#allocation5 + $0x480] sm:$0xf0]  ;;  %v3692_v40 = vld [vmem:[#allocation5 + $0x408] sm:$0xf] }
  0x50   : > { %2063 = vmatpush.bf16.msra.mxu3 %v3953_v25  ;;  %v4536_v41 = vld [vmem:[#allocation5 + $0x484] sm:$0xf0]  ;;  %v4520_v42 = vld [vmem:[#allocation5 + $0x40c] sm:$0xf]  ;;  %v3685_v44 = vor.u32 %v4535_v36, %v3684_v35  ;;  %v3689_v45 = vor.u32 %v4519_v37, %v3686_v39  ;;  %v3556_v47 = vld [vmem:[#allocation5 + $0x300] sm:$0xf] }
  0x51   : > { %v3694_v43 = vld [vmem:[#allocation5 + $0x488] sm:$0xf0]  ;;  %v3693_v46 = vor.u32 %v4536_v41, %v3692_v40  ;;  %v4503_v48 = vld [vmem:[#allocation5 + $0x37c] sm:$0xf0]  ;;  %v4487_v49 = vld [vmem:[#allocation5 + $0x304] sm:$0xf] }
  0x52   : > { %2025 = vmatpush.bf16.msra.mxu0 %v3813_v29  ;;  %2038 = vmatpush.bf16.msra.mxu1 %v3817_v33  ;;  %v3697_v50 = vor.u32 %v4520_v42, %v3694_v43  ;;  %v3558_v51 = vld [vmem:[#allocation5 + $0x380] sm:$0xf0]  ;;  %v3564_v52 = vld [vmem:[#allocation5 + $0x308] sm:$0xf]  ;;  %v4488_v54 = vld [vmem:[#allocation5 + $0x30c] sm:$0xf]  ;;  %v3557_v56 = vor.u32 %v4503_v48, %v3556_v47 }
  0x53   : > { %2051 = vmatpush.bf16.msra.mxu2 %v3821_v34  ;;  %v4504_v53 = vld [vmem:[#allocation5 + $0x384] sm:$0xf0]  ;;  %v3566_v55 = vld [vmem:[#allocation5 + $0x388] sm:$0xf0]  ;;  %v3561_v57 = vor.u32 %v4487_v49, %v3558_v51  ;;  %v3428_v59 = vld [vmem:[#allocation5 + $0x200] sm:$0xf] }
  0x54   : > { %2064 = vmatpush.bf16.msra.mxu3 %v3825_v38  ;;  %v3565_v58 = vor.u32 %v4504_v53, %v3564_v52  ;;  %v4471_v60 = vld [vmem:[#allocation5 + $0x27c] sm:$0xf0]  ;;  %v4455_v61 = vld [vmem:[#allocation5 + $0x204] sm:$0xf]  ;;  %v3569_v62 = vor.u32 %v4488_v54, %v3566_v55  ;;  %v3436_v0 = vld [vmem:[#allocation5 + $0x208] sm:$0xf] }
  0x55   : > { %v3430_v63 = vld [vmem:[#allocation5 + $0x280] sm:$0xf0]  ;;  %v4472_v1 = vld [vmem:[#allocation5 + $0x284] sm:$0xf0]  ;;  %v4456_v2 = vld [vmem:[#allocation5 + $0x20c] sm:$0xf]  ;;  %v3429_v4 = vor.u32 %v4471_v60, %v3428_v59 }
  0x56   : > { %2026 = vmatpush.bf16.msra.mxu0 %v3685_v44  ;;  %2039 = vmatpush.bf16.msra.mxu1 %v3689_v45  ;;  %v3438_v3 = vld [vmem:[#allocation5 + $0x288] sm:$0xf0]  ;;  %v3433_v5 = vor.u32 %v4455_v61, %v3430_v63  ;;  %v3437_v6 = vor.u32 %v4472_v1, %v3436_v0  ;;  %v3300_v7 = vld [vmem:[#allocation5 + $0x100] sm:$0xf]  ;;  %v4423_v9 = vld [vmem:[#allocation5 + $0x104] sm:$0xf] }
  0x57   : > { %2052 = vmatpush.bf16.msra.mxu2 %v3693_v46  ;;  %v4439_v8 = vld [vmem:[#allocation5 + $0x17c] sm:$0xf0]  ;;  %v3441_v10 = vor.u32 %v4456_v2, %v3438_v3  ;;  %v3302_v11 = vld [vmem:[#allocation5 + $0x180] sm:$0xf0]  ;;  %v3308_v12 = vld [vmem:[#allocation5 + $0x108] sm:$0xf] }
  0x58   : > { %2065 = vmatpush.bf16.msra.mxu3 %v3697_v50  ;;  %v4440_v13 = vld [vmem:[#allocation5 + $0x184] sm:$0xf0]  ;;  %v4424_v14 = vld [vmem:[#allocation5 + $0x10c] sm:$0xf]  ;;  %v3301_v16 = vor.u32 %v4439_v8, %v3300_v7  ;;  %v3172_v17 = vld [vmem:[#allocation5] sm:$0xf]  ;;  %v3305_v19 = vor.u32 %v4423_v9, %v3302_v11 }
  0x59   : > { %v3310_v15 = vld [vmem:[#allocation5 + $0x188] sm:$0xf0]  ;;  %v4407_v18 = vld [vmem:[#allocation5 + $0x7c] sm:$0xf0]  ;;  %v3309_v20 = vor.u32 %v4440_v13, %v3308_v12  ;;  %v4391_v21 = vld [vmem:[#allocation5 + $0x4] sm:$0xf] }
  0x5a   : > { %2027 = vmatpush.bf16.msra.mxu0 %v3557_v56  ;;  %2040 = vmatpush.bf16.msra.mxu1 %v3561_v57  ;;  %v3174_v22 = vld [vmem:[#allocation5 + $0x80] sm:$0xf0]  ;;  %v3180_v23 = vld [vmem:[#allocation5 + $0x8] sm:$0xf]  ;;  %v3313_v24 = vor.u32 %v4424_v14, %v3310_v15  ;;  %v4392_v26 = vld [vmem:[#allocation5 + $0xc] sm:$0xf]  ;;  %v3173_v31 = vor.u32 %v4407_v18, %v3172_v17 }
  0x5b   : > { %2053 = vmatpush.bf16.msra.mxu2 %v3565_v58  ;;  %v4408_v25 = vld [vmem:[#allocation5 + $0x84] sm:$0xf0]  ;;  %v3182_v27 = vld [vmem:[#allocation5 + $0x88] sm:$0xf0]  ;;  %v4084_v28 = vld [vmem:[#allocation5 + $0x710] sm:$0xf]  ;;  %v3177_v35 = vor.u32 %v4391_v21, %v3174_v22 }
  0x5c   : > { %2066 = vmatpush.bf16.msra.mxu3 %v3569_v62  ;;  %v4633_v29 = vld [vmem:[#allocation5 + $0x78c] sm:$0xf0]  ;;  %v4617_v30 = vld [vmem:[#allocation5 + $0x714] sm:$0xf]  ;;  %v4092_v33 = vld [vmem:[#allocation5 + $0x718] sm:$0xf]  ;;  %v3181_v36 = vor.u32 %v4408_v25, %v3180_v23  ;;  %v3185_v39 = vor.u32 %v4392_v26, %v3182_v27 }
  0x5d   : > { %v4086_v32 = vld [vmem:[#allocation5 + $0x790] sm:$0xf0]  ;;  %v4634_v34 = vld [vmem:[#allocation5 + $0x794] sm:$0xf0]  ;;  %v4618_v37 = vld [vmem:[#allocation5 + $0x71c] sm:$0xf]  ;;  %v4085_v40 = vor.u32 %v4633_v29, %v4084_v28 }
  0x5e   : > { %2028 = vmatpush.bf16.msra.mxu0 %v3429_v4  ;;  %2041 = vmatpush.bf16.msra.mxu1 %v3433_v5  ;;  %v4094_v38 = vld [vmem:[#allocation5 + $0x798] sm:$0xf0]  ;;  %v4089_v41 = vor.u32 %v4617_v30, %v4086_v32  ;;  %v4093_v42 = vor.u32 %v4634_v34, %v4092_v33  ;;  %v3956_v43 = vld [vmem:[#allocation5 + $0x610] sm:$0xf]  ;;  %v4585_v45 = vld [vmem:[#allocation5 + $0x614] sm:$0xf] }
  0x5f   : > { %2054 = vmatpush.bf16.msra.mxu2 %v3437_v6  ;;  %v4601_v44 = vld [vmem:[#allocation5 + $0x68c] sm:$0xf0]  ;;  %v4097_v46 = vor.u32 %v4618_v37, %v4094_v38  ;;  %v3958_v47 = vld [vmem:[#allocation5 + $0x690] sm:$0xf0]  ;;  %v3964_v48 = vld [vmem:[#allocation5 + $0x618] sm:$0xf] }
  0x60   : > { %2067 = vmatpush.bf16.msra.mxu3 %v3441_v10  ;;  %v4602_v49 = vld [vmem:[#allocation5 + $0x694] sm:$0xf0]  ;;  %v4586_v50 = vld [vmem:[#allocation5 + $0x61c] sm:$0xf]  ;;  %v3957_v52 = vor.u32 %v4601_v44, %v3956_v43  ;;  %v3828_v53 = vld [vmem:[#allocation5 + $0x510] sm:$0xf]  ;;  %v3961_v54 = vor.u32 %v4585_v45, %v3958_v47 }
  0x61   : > { %v3966_v51 = vld [vmem:[#allocation5 + $0x698] sm:$0xf0]  ;;  %v3965_v55 = vor.u32 %v4602_v49, %v3964_v48  ;;  %v4569_v56 = vld [vmem:[#allocation5 + $0x58c] sm:$0xf0]  ;;  %v4553_v57 = vld [vmem:[#allocation5 + $0x514] sm:$0xf] }
  0x62   : > { %2029 = vmatpush.bf16.msra.mxu0 %v3301_v16  ;;  %2042 = vmatpush.bf16.msra.mxu1 %v3305_v19  ;;  %v413_v58 = vld [vmem:[%s5278_s1] sm:$0xff]  ;;  %v3969_v59 = vor.u32 %v4586_v50, %v3966_v51  ;;  %v3829_v2 = vor.u32 %v4569_v56, %v3828_v53  ;;  %s4695_s19 = smul.u32 24, %s5272_s15  ;;  %s2966_s25 = scalar_lea.sflag [#allocation4], %s5272_s15 }
  0x63   : > { %2055 = vmatpush.bf16.msra.mxu2 %v3309_v20  ;;  %v3830_v60 = vld [vmem:[#allocation5 + $0x590] sm:$0xf0]  ;;  %v3836_v61 = vld [vmem:[#allocation5 + $0x518] sm:$0xf]  ;;  %v5297_v63 = vpack.c.bf16 %v413_v58, %v413_v58  ;;  %v4554_v0 = vld [vmem:[#allocation5 + $0x51c] sm:$0xf] }
  0x64   : > { %2068 = vmatpush.bf16.msra.mxu3 %v3313_v24  ;;  %v4570_v62 = vld [vmem:[#allocation5 + $0x594] sm:$0xf0]  ;;  %v3838_v1 = vld [vmem:[#allocation5 + $0x598] sm:$0xf0]  ;;  %v3833_v3 = vor.u32 %v4553_v57, %v3830_v60  ;;  %v3700_v5 = vld [vmem:[#allocation5 + $0x410] sm:$0xf] }
  0x65   : > { %v3837_v4 = vor.u32 %v4570_v62, %v3836_v61  ;;  %v4537_v6 = vld [vmem:[#allocation5 + $0x48c] sm:$0xf0]  ;;  %v4521_v7 = vld [vmem:[#allocation5 + $0x414] sm:$0xf]  ;;  %v3841_v8 = vor.u32 %v4554_v0, %v3838_v1  ;;  %v3708_v10 = vld [vmem:[#allocation5 + $0x418] sm:$0xf] }
  0x66   : > { %2030 = vmatpush.bf16.msra.mxu0 %v3173_v31  ;;  %2043 = vmatpush.bf16.msra.mxu1 %v3177_v35  ;;  %v3702_v9 = vld [vmem:[#allocation5 + $0x490] sm:$0xf0]  ;;  %v4538_v11 = vld [vmem:[#allocation5 + $0x494] sm:$0xf0]  ;;  %v4522_v12 = vld [vmem:[#allocation5 + $0x41c] sm:$0xf]  ;;  %v3701_v14 = vor.u32 %v4537_v6, %v3700_v5 }
  0x67   : > { %2056 = vmatpush.bf16.msra.mxu2 %v3181_v36  ;;  %v3710_v13 = vld [vmem:[#allocation5 + $0x498] sm:$0xf0]  ;;  %v3705_v15 = vor.u32 %v4521_v7, %v3702_v9  ;;  %v3709_v16 = vor.u32 %v4538_v11, %v3708_v10  ;;  %v3572_v17 = vld [vmem:[#allocation5 + $0x310] sm:$0xf]  ;;  %v4489_v19 = vld [vmem:[#allocation5 + $0x314] sm:$0xf] }
  0x68   : > { %2069 = vmatpush.bf16.msra.mxu3 %v3185_v39  ;;  %v4505_v18 = vld [vmem:[#allocation5 + $0x38c] sm:$0xf0]  ;;  %v3713_v20 = vor.u32 %v4522_v12, %v3710_v13  ;;  %v3574_v21 = vld [vmem:[#allocation5 + $0x390] sm:$0xf0]  ;;  %v3580_v22 = vld [vmem:[#allocation5 + $0x318] sm:$0xf] }
  0x69   : > { %2031 = vmatmul.bf16.vlgmr.msra.gmra.mxu0 %v5297_v63  ;;  %2044 = vmatmul.bf16.vlgmr.msra.gmra.mxu1 %v5297_v63  ;;  %v4506_v23 = vld [vmem:[#allocation5 + $0x394] sm:$0xf0]  ;;  %v4490_v24 = vld [vmem:[#allocation5 + $0x31c] sm:$0xf]  ;;  %v3573_v26 = vor.u32 %v4505_v18, %v3572_v17  ;;  %v3577_v27 = vor.u32 %v4489_v19, %v3574_v21  ;;  %v3444_v29 = vld [vmem:[#allocation5 + $0x210] sm:$0xf] }
  0x6a   : > { %2075 = vmatpush.bf16.msrb.mxu0 %v4085_v40  ;;  %2088 = vmatpush.bf16.msrb.mxu1 %v4089_v41  ;;  %v3582_v25 = vld [vmem:[#allocation5 + $0x398] sm:$0xf0]  ;;  %v3581_v28 = vor.u32 %v4506_v23, %v3580_v22  ;;  %v4473_v30 = vld [vmem:[#allocation5 + $0x28c] sm:$0xf0]  ;;  %v4457_v31 = vld [vmem:[#allocation5 + $0x214] sm:$0xf] }
  0x6b   : > { %2101 = vmatpush.bf16.msrb.mxu2 %v4093_v42  ;;  %2070 = vmatmul.bf16.vlgmr.msra.gmra.mxu3 %v5297_v63  ;;  %v3585_v32 = vor.u32 %v4490_v24, %v3582_v25  ;;  %v3446_v33 = vld [vmem:[#allocation5 + $0x290] sm:$0xf0]  ;;  %v3452_v34 = vld [vmem:[#allocation5 + $0x218] sm:$0xf]  ;;  %v4458_v36 = vld [vmem:[#allocation5 + $0x21c] sm:$0xf]  ;;  %v3445_v38 = vor.u32 %v4473_v30, %v3444_v29 }
  0x6c   : > { %2114 = vmatpush.bf16.msrb.mxu3 %v4097_v46  ;;  %2057 = vmatmul.bf16.vlgmr.msra.gmra.mxu2 %v5297_v63  ;;  %v4474_v35 = vld [vmem:[#allocation5 + $0x294] sm:$0xf0]  ;;  %v3454_v37 = vld [vmem:[#allocation5 + $0x298] sm:$0xf0]  ;;  %v3449_v39 = vor.u32 %v4457_v31, %v3446_v33  ;;  %v3316_v41 = vld [vmem:[#allocation5 + $0x110] sm:$0xf] }
  0x6d   : > { %v3453_v40 = vor.u32 %v4474_v35, %v3452_v34  ;;  %v4441_v42 = vld [vmem:[#allocation5 + $0x18c] sm:$0xf0]  ;;  %v4425_v43 = vld [vmem:[#allocation5 + $0x114] sm:$0xf]  ;;  %v3457_v44 = vor.u32 %v4458_v36, %v3454_v37  ;;  %v3324_v46 = vld [vmem:[#allocation5 + $0x118] sm:$0xf] }
  0x6e   : > { %2076 = vmatpush.bf16.msrb.mxu0 %v3957_v52  ;;  %2089 = vmatpush.bf16.msrb.mxu1 %v3961_v54  ;;  %v3318_v45 = vld [vmem:[#allocation5 + $0x190] sm:$0xf0]  ;;  %v4442_v47 = vld [vmem:[#allocation5 + $0x194] sm:$0xf0]  ;;  %v4426_v48 = vld [vmem:[#allocation5 + $0x11c] sm:$0xf]  ;;  %v3317_v50 = vor.u32 %v4441_v42, %v3316_v41 }
  0x6f   : > { %2102 = vmatpush.bf16.msrb.mxu2 %v3965_v55  ;;  %v3326_v49 = vld [vmem:[#allocation5 + $0x198] sm:$0xf0]  ;;  %v3188_v51 = vld [vmem:[#allocation5 + $0x10] sm:$0xf]  ;;  %v3321_v53 = vor.u32 %v4425_v43, %v3318_v45  ;;  %v3325_v54 = vor.u32 %v4442_v47, %v3324_v46  ;;  %v4393_v55 = vld [vmem:[#allocation5 + $0x14] sm:$0xf] }
  0x70   : > { %2115 = vmatpush.bf16.msrb.mxu3 %v3969_v59  ;;  %v4409_v52 = vld [vmem:[#allocation5 + $0x8c] sm:$0xf0]  ;;  %v3190_v56 = vld [vmem:[#allocation5 + $0x90] sm:$0xf0]  ;;  %v3196_v57 = vld [vmem:[#allocation5 + $0x18] sm:$0xf]  ;;  %v3329_v58 = vor.u32 %v4426_v48, %v3326_v49 }
  0x71   : > { %v4410_v59 = vld [vmem:[#allocation5 + $0x94] sm:$0xf0]  ;;  %v4394_v60 = vld [vmem:[#allocation5 + $0x1c] sm:$0xf]  ;;  %v4100_v62 = vld [vmem:[#allocation5 + $0x720] sm:$0xf]  ;;  %v3193_v6 = vor.u32 %v4393_v55, %v3190_v56 }
  0x72   : > { %2077 = vmatpush.bf16.msrb.mxu0 %v3829_v2  ;;  %2090 = vmatpush.bf16.msrb.mxu1 %v3833_v3  ;;  %v3198_v61 = vld [vmem:[#allocation5 + $0x98] sm:$0xf0]  ;;  %v4635_v0 = vld [vmem:[#allocation5 + $0x79c] sm:$0xf0]  ;;  %v4619_v1 = vld [vmem:[#allocation5 + $0x724] sm:$0xf]  ;;  %v3189_v2 = vor.u32 %v4409_v52, %v3188_v51  ;;  %v3197_v7 = vor.u32 %v4410_v59, %v3196_v57 }
  0x73   : > { %2103 = vmatpush.bf16.msrb.mxu2 %v3837_v4  ;;  %v4102_v3 = vld [vmem:[#allocation5 + $0x7a0] sm:$0xf0]  ;;  %v4108_v4 = vld [vmem:[#allocation5 + $0x728] sm:$0xf]  ;;  %v4110_v9 = vld [vmem:[#allocation5 + $0x7a8] sm:$0xf0]  ;;  %v3201_v10 = vor.u32 %v4394_v60, %v3198_v61  ;;  %v4101_v11 = vor.u32 %v4635_v0, %v4100_v62 }
  0x74   : > { %2116 = vmatpush.bf16.msrb.mxu3 %v3841_v8  ;;  %v4636_v5 = vld [vmem:[#allocation5 + $0x7a4] sm:$0xf0]  ;;  %v4620_v8 = vld [vmem:[#allocation5 + $0x72c] sm:$0xf]  ;;  %v4105_v12 = vor.u32 %v4619_v1, %v4102_v3  ;;  %v3974_v18 = vld [vmem:[#allocation5 + $0x6a0] sm:$0xf0] }
  0x75   : > { %v4109_v13 = vor.u32 %v4636_v5, %v4108_v4  ;;  %v4113_v17 = vor.u32 %v4620_v8, %v4110_v9  ;;  %v3980_v19 = vld [vmem:[#allocation5 + $0x628] sm:$0xf]  ;;  %v4588_v21 = vld [vmem:[#allocation5 + $0x62c] sm:$0xf]  ;;  %v3846_v30 = vld [vmem:[#allocation5 + $0x5a0] sm:$0xf0] }
  0x76   : > { %2078 = vmatpush.bf16.msrb.mxu0 %v3701_v14  ;;  %2091 = vmatpush.bf16.msrb.mxu1 %v3705_v15  ;;  %v3972_v14 = vld [vmem:[#allocation5 + $0x620] sm:$0xf]  ;;  %v3982_v22 = vld [vmem:[#allocation5 + $0x6a8] sm:$0xf0]  ;;  %v3852_v31 = vld [vmem:[#allocation5 + $0x528] sm:$0xf] }
  0x77   : > { %2104 = vmatpush.bf16.msrb.mxu2 %v3709_v16  ;;  %v4603_v15 = vld [vmem:[#allocation5 + $0x69c] sm:$0xf0]  ;;  %v4587_v16 = vld [vmem:[#allocation5 + $0x624] sm:$0xf]  ;;  %v3985_v29 = vor.u32 %v4588_v21, %v3982_v22  ;;  %v4556_v33 = vld [vmem:[#allocation5 + $0x52c] sm:$0xf] }
  0x78   : > { %2117 = vmatpush.bf16.msrb.mxu3 %v3713_v20  ;;  %v4604_v20 = vld [vmem:[#allocation5 + $0x6a4] sm:$0xf0]  ;;  %v3973_v23 = vor.u32 %v4603_v15, %v3972_v14  ;;  %v3977_v24 = vor.u32 %v4587_v16, %v3974_v18  ;;  %v3854_v34 = vld [vmem:[#allocation5 + $0x5a8] sm:$0xf0]  ;;  %v3718_v42 = vld [vmem:[#allocation5 + $0x4a0] sm:$0xf0] }
  0x79   : > { %v3981_v25 = vor.u32 %v4604_v20, %v3980_v19  ;;  %v3857_v41 = vor.u32 %v4556_v33, %v3854_v34  ;;  %v3724_v43 = vld [vmem:[#allocation5 + $0x428] sm:$0xf]  ;;  %v4524_v45 = vld [vmem:[#allocation5 + $0x42c] sm:$0xf]  ;;  %v4507_v51 = vld [vmem:[#allocation5 + $0x39c] sm:$0xf0] }
  0x7a   : > { %2079 = vmatpush.bf16.msrb.mxu0 %v3573_v26  ;;  %2092 = vmatpush.bf16.msrb.mxu1 %v3577_v27  ;;  %v3844_v26 = vld [vmem:[#allocation5 + $0x520] sm:$0xf]  ;;  %v3726_v46 = vld [vmem:[#allocation5 + $0x4a8] sm:$0xf0]  ;;  %v4491_v52 = vld [vmem:[#allocation5 + $0x324] sm:$0xf] }
  0x7b   : > { %2105 = vmatpush.bf16.msrb.mxu2 %v3581_v28  ;;  %v4571_v27 = vld [vmem:[#allocation5 + $0x59c] sm:$0xf0]  ;;  %v4555_v28 = vld [vmem:[#allocation5 + $0x524] sm:$0xf]  ;;  %v3596_v55 = vld [vmem:[#allocation5 + $0x328] sm:$0xf] }
  0x7c   : > { %2118 = vmatpush.bf16.msrb.mxu3 %v3585_v32  ;;  %v4572_v32 = vld [vmem:[#allocation5 + $0x5a4] sm:$0xf0]  ;;  %v3845_v35 = vor.u32 %v4571_v27, %v3844_v26  ;;  %v3849_v36 = vor.u32 %v4555_v28, %v3846_v30  ;;  %v4492_v57 = vld [vmem:[#allocation5 + $0x32c] sm:$0xf]  ;;  %v3460_v62 = vld [vmem:[#allocation5 + $0x220] sm:$0xf] }
  0x7d   : > { %v3853_v37 = vor.u32 %v4572_v32, %v3852_v31  ;;  %v4508_v56 = vld [vmem:[#allocation5 + $0x3a4] sm:$0xf0]  ;;  %v4475_v0 = vld [vmem:[#allocation5 + $0x29c] sm:$0xf0]  ;;  %v4459_v1 = vld [vmem:[#allocation5 + $0x224] sm:$0xf] }
  0x7e   : > { %2080 = vmatpush.bf16.msrb.mxu0 %v3445_v38  ;;  %2093 = vmatpush.bf16.msrb.mxu1 %v3449_v39  ;;  %v3716_v38 = vld [vmem:[#allocation5 + $0x420] sm:$0xf]  ;;  %v3597_v61 = vor.u32 %v4508_v56, %v3596_v55  ;;  %v3462_v3 = vld [vmem:[#allocation5 + $0x2a0] sm:$0xf0]  ;;  %v3468_v4 = vld [vmem:[#allocation5 + $0x228] sm:$0xf]  ;;  %v3461_v8 = vor.u32 %v4475_v0, %v3460_v62 }
  0x7f   : > { %2106 = vmatpush.bf16.msrb.mxu2 %v3453_v40  ;;  %v4539_v39 = vld [vmem:[#allocation5 + $0x49c] sm:$0xf0]  ;;  %v4523_v40 = vld [vmem:[#allocation5 + $0x424] sm:$0xf]  ;;  %v4476_v5 = vld [vmem:[#allocation5 + $0x2a4] sm:$0xf0]  ;;  %v3465_v9 = vor.u32 %v4459_v1, %v3462_v3 }
  0x80   : > { %2119 = vmatpush.bf16.msrb.mxu3 %v3457_v44  ;;  %v4540_v44 = vld [vmem:[#allocation5 + $0x4a4] sm:$0xf0]  ;;  %v3717_v47 = vor.u32 %v4539_v39, %v3716_v38  ;;  %v3721_v48 = vor.u32 %v4523_v40, %v3718_v42  ;;  %v3334_v15 = vld [vmem:[#allocation5 + $0x1a0] sm:$0xf0]  ;;  %v4428_v18 = vld [vmem:[#allocation5 + $0x12c] sm:$0xf] }
  0x81   : > { %v3725_v49 = vor.u32 %v4540_v44, %v3724_v43  ;;  %v3340_v16 = vld [vmem:[#allocation5 + $0x128] sm:$0xf]  ;;  %v3342_v19 = vld [vmem:[#allocation5 + $0x1a8] sm:$0xf0]  ;;  %v3204_v21 = vld [vmem:[#allocation5 + $0x20] sm:$0xf] }
  0x82   : > { %2081 = vmatpush.bf16.msrb.mxu0 %v3317_v50  ;;  %2094 = vmatpush.bf16.msrb.mxu1 %v3321_v53  ;;  %v3588_v50 = vld [vmem:[#allocation5 + $0x320] sm:$0xf]  ;;  %v3729_v53 = vor.u32 %v4524_v45, %v3726_v46  ;;  %v3206_v26 = vld [vmem:[#allocation5 + $0xa0] sm:$0xf0]  ;;  %v3212_v27 = vld [vmem:[#allocation5 + $0x28] sm:$0xf]  ;;  %v3345_v28 = vor.u32 %v4428_v18, %v3342_v19 }
  0x83   : > { %2107 = vmatpush.bf16.msrb.mxu2 %v3325_v54  ;;  %v3590_v54 = vld [vmem:[#allocation5 + $0x3a0] sm:$0xf0]  ;;  %v3589_v59 = vor.u32 %v4507_v51, %v3588_v50  ;;  %v4411_v22 = vld [vmem:[#allocation5 + $0x9c] sm:$0xf0]  ;;  %v4396_v30 = vld [vmem:[#allocation5 + $0x2c] sm:$0xf] }
  0x84   : > { %2120 = vmatpush.bf16.msrb.mxu3 %v3329_v58  ;;  %v3598_v58 = vld [vmem:[#allocation5 + $0x3a8] sm:$0xf0]  ;;  %v3593_v60 = vor.u32 %v4491_v52, %v3590_v54  ;;  %v4116_v32 = vld [vmem:[#allocation5 + $0x730] sm:$0xf]  ;;  %v4621_v34 = vld [vmem:[#allocation5 + $0x734] sm:$0xf] }
  0x85   : > { %v3214_v31 = vld [vmem:[#allocation5 + $0xa8] sm:$0xf0]  ;;  %v4637_v33 = vld [vmem:[#allocation5 + $0x7ac] sm:$0xf0]  ;;  %v4638_v38 = vld [vmem:[#allocation5 + $0x7b4] sm:$0xf0] }
  0x86   : > { %2082 = vmatpush.bf16.msrb.mxu0 %v3189_v2  ;;  %2095 = vmatpush.bf16.msrb.mxu1 %v3193_v6  ;;  %v3601_v2 = vor.u32 %v4492_v57, %v3598_v58  ;;  %v4460_v6 = vld [vmem:[#allocation5 + $0x22c] sm:$0xf]  ;;  %v4126_v42 = vld [vmem:[#allocation5 + $0x7b8] sm:$0xf0]  ;;  %v3217_v43 = vor.u32 %v4396_v30, %v3214_v31  ;;  %v4117_v44 = vor.u32 %v4637_v33, %v4116_v32  ;;  %v3990_v51 = vld [vmem:[#allocation5 + $0x6b0] sm:$0xf0] }
  0x87   : > { %2108 = vmatpush.bf16.msrb.mxu2 %v3197_v7  ;;  %v3470_v7 = vld [vmem:[#allocation5 + $0x2a8] sm:$0xf0]  ;;  %v3996_v52 = vld [vmem:[#allocation5 + $0x638] sm:$0xf]  ;;  %v4590_v54 = vld [vmem:[#allocation5 + $0x63c] sm:$0xf] }
  0x88   : > { %2121 = vmatpush.bf16.msrb.mxu3 %v3201_v10  ;;  %v3469_v10 = vor.u32 %v4476_v5, %v3468_v4  ;;  %v3473_v14 = vor.u32 %v4460_v6, %v3470_v7  ;;  %v3998_v55 = vld [vmem:[#allocation5 + $0x6b8] sm:$0xf0]  ;;  %v3862_v0 = vld [vmem:[#allocation5 + $0x5b0] sm:$0xf0]  ;;  %v3868_v1 = vld [vmem:[#allocation5 + $0x538] sm:$0xf] }
  0x89   : > { %2083 = vmatmul.bf16.vlgmr.msrb.gmra.mxu0 %v5297_v63  ;;  %2096 = vmatmul.bf16.vlgmr.msrb.gmra.mxu1 %v5297_v63  ;;  %v4001_v62 = vor.u32 %v4590_v54, %v3998_v55  ;;  %v4558_v3 = vld [vmem:[#allocation5 + $0x53c] sm:$0xf]  ;;  %v3476_v32 = vld [vmem:[#allocation5 + $0x230] sm:$0xf]  ;;  %s405_s26 = scalar_lea.vmem [#allocation13], %s4695_s19  ;;  %s4696_s16 = smul.u32 24, %s5179_s12 }
  0x8a   : > { %2127 = vmatpush.bf16.msra.mxu0 %v4101_v11  ;;  %2140 = vmatpush.bf16.msra.mxu1 %v4105_v12  ;;  %v3332_v11 = vld [vmem:[#allocation5 + $0x120] sm:$0xf]  ;;  %v3870_v4 = vld [vmem:[#allocation5 + $0x5b8] sm:$0xf0]  ;;  %v4477_v33 = vld [vmem:[#allocation5 + $0x2ac] sm:$0xf0] }
  0x8b   : > { %2153 = vmatpush.bf16.msra.mxu2 %v4109_v13  ;;  %2122 = vmatmul.bf16.vlgmr.msrb.gmra.mxu3 %v5297_v63  ;;  %v4443_v12 = vld [vmem:[#allocation5 + $0x19c] sm:$0xf0]  ;;  %v4427_v13 = vld [vmem:[#allocation5 + $0x124] sm:$0xf]  ;;  %v3220_v54 = vld [vmem:[#allocation5 + $0x30] sm:$0xf]  ;;  %s2982_s21 = scalar_lea.hbm %s5456_s7, %s4696_s16 }
  0x8c   : > { %2166 = vmatpush.bf16.msra.mxu3 %v4113_v17  ;;  %2109 = vmatmul.bf16.vlgmr.msrb.gmra.mxu2 %v5297_v63  ;;  %v4444_v17 = vld [vmem:[#allocation5 + $0x1a4] sm:$0xf0]  ;;  %v3333_v20 = vor.u32 %v4443_v12, %v3332_v11  ;;  %v3873_v11 = vor.u32 %v4558_v3, %v3870_v4  ;;  %v3734_v12 = vld [vmem:[#allocation5 + $0x4b0] sm:$0xf0]  ;;  %v4413_v55 = vld [vmem:[#allocation5 + $0xac] sm:$0xf0] }
  0x8d   : > { %v4639_v3 = vld [vmem:[#allocation5 + $0x7bc] sm:$0xf0]  ;;  %v4623_v4 = vld [vmem:[#allocation5 + $0x744] sm:$0xf]  ;;  %s2984_s10 = sshll.u32 %s405_s26, 4  ;;  %s2986_s24 = sshll.u32 %s2982_s21, 4  ;;  %s2985_s10 = int_to_ptr.vmem [resolvable:$true] %s2984_s10  ;;  %s2987_s24 = int_to_ptr.hbm [resolvable:$true] %s2986_s24 }
  0x8e   : > { %2128 = vmatpush.bf16.msra.mxu0 %v3973_v23  ;;  %2141 = vmatpush.bf16.msra.mxu1 %v3977_v24  ;;  %v3337_v23 = vor.u32 %v4427_v13, %v3334_v15  ;;  %v3341_v24 = vor.u32 %v4444_v17, %v3340_v16  ;;  %v3740_v13 = vld [vmem:[#allocation5 + $0x438] sm:$0xf]  ;;  %v4526_v15 = vld [vmem:[#allocation5 + $0x43c] sm:$0xf]  ;;  %s5001_s22 = sshra.s32 %s2987_s24, 4  ;;  %s5007_s19 = scalar_lea.hbm %s5456_s7, 48  ;;  %s5002_s22 = int_to_ptr.hbm [resolvable:$true] %s5001_s22 }
  0x8f   : > { %2154 = vmatpush.bf16.msra.mxu2 %v3981_v25  ;;  %v4395_v25 = vld [vmem:[#allocation5 + $0x24] sm:$0xf]  ;;  %v3742_v16 = vld [vmem:[#allocation5 + $0x4b8] sm:$0xf0]  ;;  %s5003_s1 = scalar_lea.hbm %s5002_s22, 24  ;;  %p5008_p12 = scmp.lt.s32.totalorder %s5002_s22, %s5456_s7 }
  0x90   : > { %2167 = vmatpush.bf16.msra.mxu3 %v3985_v29  ;;  %v4412_v29 = vld [vmem:[#allocation5 + $0xa4] sm:$0xf0]  ;;  %v3209_v39 = vor.u32 %v4395_v25, %v3206_v26  ;;  %v3612_v25 = vld [vmem:[#allocation5 + $0x338] sm:$0xf]  ;;  %p5004_p1 = scmp.ne.s32.totalorder %s5002_s22, %s5003_s1  ;;  %p5009_p8 = scmp.lt.s32.totalorder %s5007_s19, %s5003_s1 }
  0x91   : > { %v3213_v40 = vor.u32 %v4412_v29, %v3212_v27  ;;  %v4510_v26 = vld [vmem:[#allocation5 + $0x3b4] sm:$0xf0]  ;;  %v4494_v27 = vld [vmem:[#allocation5 + $0x33c] sm:$0xf] }
  0x92   : > { %2129 = vmatpush.bf16.msra.mxu0 %v3845_v35  ;;  %2142 = vmatpush.bf16.msra.mxu1 %v3849_v36  ;;  %v3205_v35 = vor.u32 %v4411_v22, %v3204_v21  ;;  %v4118_v36 = vld [vmem:[#allocation5 + $0x7b0] sm:$0xf0]  ;;  %v4509_v21 = vld [vmem:[#allocation5 + $0x3ac] sm:$0xf0]  ;;  %v3613_v31 = vor.u32 %v4510_v26, %v3612_v25  ;;  %v4014_v25 = vld [vmem:[#allocation5 + $0x6c8] sm:$0xf0]  ;;  %p5005_p3 = pnand %p5004_p1, %p5241_p13  ;;  %p5010_p7 = por %p5009_p8, %p5008_p12 }
  0x93   : > { %2155 = vmatpush.bf16.msra.mxu2 %v3853_v37  ;;  %v4124_v37 = vld [vmem:[#allocation5 + $0x738] sm:$0xf]  ;;  %v4121_v45 = vor.u32 %v4621_v34, %v4118_v36  ;;  %v4493_v22 = vld [vmem:[#allocation5 + $0x334] sm:$0xf] }
  0x94   : > { %2168 = vmatpush.bf16.msra.mxu3 %v3857_v41  ;;  %v4622_v41 = vld [vmem:[#allocation5 + $0x73c] sm:$0xf]  ;;  %v4125_v46 = vor.u32 %v4638_v38, %v4124_v37  ;;  %v4461_v34 = vld [vmem:[#allocation5 + $0x234] sm:$0xf]  ;;  %v3484_v37 = vld [vmem:[#allocation5 + $0x238] sm:$0xf]  ;;  %p5006_p5 = pneg %p5005_p3 }
  0x95   : > { %v4129_v50 = vor.u32 %v4622_v41, %v4126_v42  ;;  %v3478_v36 = vld [vmem:[#allocation5 + $0x2b0] sm:$0xf0]  ;;  %v4478_v38 = vld [vmem:[#allocation5 + $0x2b4] sm:$0xf0]  ;;  %v3477_v41 = vor.u32 %v4477_v33, %v3476_v32  ;;  %v3878_v33 = vld [vmem:[#allocation5 + $0x5c0] sm:$0xf0] }
  0x96   : > { %2130 = vmatpush.bf16.msra.mxu0 %v3717_v47  ;;  %2143 = vmatpush.bf16.msra.mxu1 %v3721_v48  ;;  %v3988_v47 = vld [vmem:[#allocation5 + $0x630] sm:$0xf]  ;;  %v3481_v42 = vor.u32 %v4461_v34, %v3478_v36  ;;  %v3884_v34 = vld [vmem:[#allocation5 + $0x548] sm:$0xf]  ;;  %v4560_v36 = vld [vmem:[#allocation5 + $0x54c] sm:$0xf]  ;;  %p5011_p9 = pnand %p5010_p7, %p5006_p5 }
  0x97   : > { %2156 = vmatpush.bf16.msra.mxu2 %v3725_v49  ;;  %v4605_v48 = vld [vmem:[#allocation5 + $0x6ac] sm:$0xf0]  ;;  %v4589_v49 = vld [vmem:[#allocation5 + $0x634] sm:$0xf] }
  0x98   : > { %2169 = vmatpush.bf16.msra.mxu3 %v3729_v53  ;;  %v4606_v53 = vld [vmem:[#allocation5 + $0x6b4] sm:$0xf0]  ;;  %v3989_v56 = vor.u32 %v4605_v48, %v3988_v47  ;;  %v3993_v57 = vor.u32 %v4589_v49, %v3990_v51  ;;  %v3350_v48 = vld [vmem:[#allocation5 + $0x1b0] sm:$0xf0]  ;;  %v4430_v51 = vld [vmem:[#allocation5 + $0x13c] sm:$0xf] }
  0x99   : > { %v3997_v58 = vor.u32 %v4606_v53, %v3996_v52  ;;  %v3356_v49 = vld [vmem:[#allocation5 + $0x138] sm:$0xf]  ;;  %v3358_v52 = vld [vmem:[#allocation5 + $0x1b8] sm:$0xf0] }
  0x9a   : > { %2131 = vmatpush.bf16.msra.mxu0 %v3589_v59  ;;  %2144 = vmatpush.bf16.msra.mxu1 %v3593_v60  ;;  %v3860_v59 = vld [vmem:[#allocation5 + $0x530] sm:$0xf] }
  0x9b   : > { %2157 = vmatpush.bf16.msra.mxu2 %v3597_v61  ;;  %v4573_v60 = vld [vmem:[#allocation5 + $0x5ac] sm:$0xf0]  ;;  %v4557_v61 = vld [vmem:[#allocation5 + $0x534] sm:$0xf] }
  0x9c   : > { %2170 = vmatpush.bf16.msra.mxu3 %v3601_v2  ;;  %v4574_v2 = vld [vmem:[#allocation5 + $0x5b4] sm:$0xf0]  ;;  %v3861_v5 = vor.u32 %v4573_v60, %v3860_v59  ;;  %v3865_v6 = vor.u32 %v4557_v61, %v3862_v0  ;;  %v3222_v59 = vld [vmem:[#allocation5 + $0xb0] sm:$0xf0]  ;;  %v3361_v61 = vor.u32 %v4430_v51, %v3358_v52  ;;  %v4398_v0 = vld [vmem:[#allocation5 + $0x3c] sm:$0xf] }
  0x9d   : > { %v3869_v7 = vor.u32 %v4574_v2, %v3868_v1  ;;  %v3228_v60 = vld [vmem:[#allocation5 + $0x38] sm:$0xf]  ;;  %v3230_v1 = vld [vmem:[#allocation5 + $0xb8] sm:$0xf0]  ;;  %v4132_v2 = vld [vmem:[#allocation5 + $0x740] sm:$0xf] }
  0x9e   : > { %2132 = vmatpush.bf16.msra.mxu0 %v3461_v8  ;;  %2145 = vmatpush.bf16.msra.mxu1 %v3465_v9  ;;  %v3732_v8 = vld [vmem:[#allocation5 + $0x430] sm:$0xf] }
  0x9f   : > { %2158 = vmatpush.bf16.msra.mxu2 %v3469_v10  ;;  %v4541_v9 = vld [vmem:[#allocation5 + $0x4ac] sm:$0xf0]  ;;  %v4525_v10 = vld [vmem:[#allocation5 + $0x434] sm:$0xf] }
  0xa0   : > { %2171 = vmatpush.bf16.msra.mxu3 %v3473_v14  ;;  %v4542_v14 = vld [vmem:[#allocation5 + $0x4b4] sm:$0xf0]  ;;  %v3733_v17 = vor.u32 %v4541_v9, %v3732_v8  ;;  %v3737_v18 = vor.u32 %v4525_v10, %v3734_v12  ;;  %v4640_v8 = vld [vmem:[#allocation5 + $0x7c4] sm:$0xf0]  ;;  %v4142_v12 = vld [vmem:[#allocation5 + $0x7c8] sm:$0xf0] }
  0xa1   : > { %v3741_v19 = vor.u32 %v4542_v14, %v3740_v13  ;;  %v3233_v13 = vor.u32 %v4398_v0, %v3230_v1  ;;  %v4133_v14 = vor.u32 %v4639_v3, %v4132_v2  ;;  %v3492_v2 = vld [vmem:[#allocation5 + $0x240] sm:$0xf] }
  0xa2   : > { %2133 = vmatpush.bf16.msra.mxu0 %v3333_v20  ;;  %2146 = vmatpush.bf16.msra.mxu1 %v3337_v23  ;;  %v3604_v20 = vld [vmem:[#allocation5 + $0x330] sm:$0xf]  ;;  %v3745_v23 = vor.u32 %v4526_v15, %v3742_v16  ;;  %v4479_v3 = vld [vmem:[#allocation5 + $0x2bc] sm:$0xf0] }
  0xa3   : > { %2159 = vmatpush.bf16.msra.mxu2 %v3341_v24  ;;  %v3606_v24 = vld [vmem:[#allocation5 + $0x3b0] sm:$0xf0]  ;;  %v3605_v29 = vor.u32 %v4509_v21, %v3604_v20  ;;  %v4006_v21 = vld [vmem:[#allocation5 + $0x6c0] sm:$0xf0] }
  0xa4   : > { %2172 = vmatpush.bf16.msra.mxu3 %v3345_v28  ;;  %v3614_v28 = vld [vmem:[#allocation5 + $0x3b8] sm:$0xf0]  ;;  %v3609_v30 = vor.u32 %v4493_v22, %v3606_v24  ;;  %v4012_v22 = vld [vmem:[#allocation5 + $0x648] sm:$0xf]  ;;  %v4592_v24 = vld [vmem:[#allocation5 + $0x64c] sm:$0xf] }
  0xa5   : > { %v4017_v32 = vor.u32 %v4592_v24, %v4014_v25  ;;  %v3236_v24 = vld [vmem:[#allocation5 + $0x40] sm:$0xf] }
  0xa6   : > { %2134 = vmatpush.bf16.msra.mxu0 %v3205_v35  ;;  %2147 = vmatpush.bf16.msra.mxu1 %v3209_v39  ;;  %v3617_v35 = vor.u32 %v4494_v27, %v3614_v28  ;;  %v4462_v39 = vld [vmem:[#allocation5 + $0x23c] sm:$0xf]  ;;  %v4415_v25 = vld [vmem:[#allocation5 + $0xbc] sm:$0xf0] }
  0xa7   : > { %2160 = vmatpush.bf16.msra.mxu2 %v3213_v40  ;;  %v3486_v40 = vld [vmem:[#allocation5 + $0x2b8] sm:$0xf0] }
  0xa8   : > { %2173 = vmatpush.bf16.msra.mxu3 %v3217_v43  ;;  %v3485_v43 = vor.u32 %v4478_v38, %v3484_v37  ;;  %v3489_v47 = vor.u32 %v4462_v39, %v3486_v40  ;;  %v3886_v37 = vld [vmem:[#allocation5 + $0x5c8] sm:$0xf0] }
  0xa9   : > { %2135 = vmatmul.bf16.vlgmr.msra.gmra.mxu0 %v5297_v63  ;;  %2148 = vmatmul.bf16.vlgmr.msra.gmra.mxu1 %v5297_v63 }
  0xaa   : > { %2179 = vmatpush.bf16.msrb.mxu0 %v4117_v44  ;;  %2192 = vmatpush.bf16.msrb.mxu1 %v4121_v45  ;;  %v3348_v44 = vld [vmem:[#allocation5 + $0x130] sm:$0xf] }
  0xab   : > { %2205 = vmatpush.bf16.msrb.mxu2 %v4125_v46  ;;  %2174 = vmatmul.bf16.vlgmr.msra.gmra.mxu3 %v5297_v63  ;;  %v4445_v45 = vld [vmem:[#allocation5 + $0x1ac] sm:$0xf0]  ;;  %v4429_v46 = vld [vmem:[#allocation5 + $0x134] sm:$0xf] }
  0xac   : > { %2218 = vmatpush.bf16.msrb.mxu3 %v4129_v50  ;;  %2161 = vmatmul.bf16.vlgmr.msra.gmra.mxu2 %v5297_v63  ;;  %v4446_v50 = vld [vmem:[#allocation5 + $0x1b4] sm:$0xf0]  ;;  %v3349_v53 = vor.u32 %v4445_v45, %v3348_v44  ;;  %v3889_v44 = vor.u32 %v4560_v36, %v3886_v37  ;;  %v3750_v45 = vld [vmem:[#allocation5 + $0x4c0] sm:$0xf0]  ;;  %v4641_v36 = vld [vmem:[#allocation5 + $0x7cc] sm:$0xf0] }
  0xad   : > { %v4625_v37 = vld [vmem:[#allocation5 + $0x754] sm:$0xf] }
  0xae   : > { %2180 = vmatpush.bf16.msrb.mxu0 %v3989_v56  ;;  %2193 = vmatpush.bf16.msrb.mxu1 %v3993_v57  ;;  %v3353_v56 = vor.u32 %v4429_v46, %v3350_v48  ;;  %v3357_v57 = vor.u32 %v4446_v50, %v3356_v49  ;;  %v3756_v46 = vld [vmem:[#allocation5 + $0x448] sm:$0xf]  ;;  %v4528_v48 = vld [vmem:[#allocation5 + $0x44c] sm:$0xf] }
  0xaf   : > { %2206 = vmatpush.bf16.msrb.mxu2 %v3997_v58  ;;  %v4397_v58 = vld [vmem:[#allocation5 + $0x34] sm:$0xf]  ;;  %v3758_v49 = vld [vmem:[#allocation5 + $0x4c8] sm:$0xf0] }
  0xb0   : > { %2219 = vmatpush.bf16.msrb.mxu3 %v4001_v62  ;;  %v4414_v62 = vld [vmem:[#allocation5 + $0xb4] sm:$0xf0]  ;;  %v3225_v9 = vor.u32 %v4397_v58, %v3222_v59  ;;  %v3628_v58 = vld [vmem:[#allocation5 + $0x348] sm:$0xf] }
  0xb1   : > { %v3229_v10 = vor.u32 %v4414_v62, %v3228_v60  ;;  %v4512_v59 = vld [vmem:[#allocation5 + $0x3c4] sm:$0xf0]  ;;  %v4496_v60 = vld [vmem:[#allocation5 + $0x34c] sm:$0xf] }
  0xb2   : > { %2181 = vmatpush.bf16.msrb.mxu0 %v3861_v5  ;;  %2194 = vmatpush.bf16.msrb.mxu1 %v3865_v6  ;;  %v3221_v5 = vor.u32 %v4413_v55, %v3220_v54  ;;  %v4134_v6 = vld [vmem:[#allocation5 + $0x7c0] sm:$0xf0]  ;;  %v4511_v54 = vld [vmem:[#allocation5 + $0x3bc] sm:$0xf0]  ;;  %v3629_v1 = vor.u32 %v4512_v59, %v3628_v58  ;;  %v4030_v58 = vld [vmem:[#allocation5 + $0x6d8] sm:$0xf0] }
  0xb3   : > { %2207 = vmatpush.bf16.msrb.mxu2 %v3869_v7  ;;  %v4140_v7 = vld [vmem:[#allocation5 + $0x748] sm:$0xf]  ;;  %v4137_v15 = vor.u32 %v4623_v4, %v4134_v6  ;;  %v4495_v55 = vld [vmem:[#allocation5 + $0x344] sm:$0xf] }
  0xb4   : > { %2220 = vmatpush.bf16.msrb.mxu3 %v3873_v11  ;;  %v4624_v11 = vld [vmem:[#allocation5 + $0x74c] sm:$0xf]  ;;  %v4141_v16 = vor.u32 %v4640_v8, %v4140_v7  ;;  %v4463_v4 = vld [vmem:[#allocation5 + $0x244] sm:$0xf]  ;;  %v3500_v7 = vld [vmem:[#allocation5 + $0x248] sm:$0xf] }
  0xb5   : > { %v4145_v20 = vor.u32 %v4624_v11, %v4142_v12  ;;  %v3494_v6 = vld [vmem:[#allocation5 + $0x2c0] sm:$0xf0]  ;;  %v4480_v8 = vld [vmem:[#allocation5 + $0x2c4] sm:$0xf0]  ;;  %v3493_v11 = vor.u32 %v4479_v3, %v3492_v2  ;;  %v3894_v3 = vld [vmem:[#allocation5 + $0x5d0] sm:$0xf0] }
  0xb6   : > { %2182 = vmatpush.bf16.msrb.mxu0 %v3733_v17  ;;  %2195 = vmatpush.bf16.msrb.mxu1 %v3737_v18  ;;  %v4004_v17 = vld [vmem:[#allocation5 + $0x640] sm:$0xf]  ;;  %v3497_v12 = vor.u32 %v4463_v4, %v3494_v6  ;;  %v3900_v4 = vld [vmem:[#allocation5 + $0x558] sm:$0xf]  ;;  %v4562_v6 = vld [vmem:[#allocation5 + $0x55c] sm:$0xf] }
  0xb7   : > { %2208 = vmatpush.bf16.msrb.mxu2 %v3741_v19  ;;  %v4607_v18 = vld [vmem:[#allocation5 + $0x6bc] sm:$0xf0]  ;;  %v4591_v19 = vld [vmem:[#allocation5 + $0x644] sm:$0xf] }
  0xb8   : > { %2221 = vmatpush.bf16.msrb.mxu3 %v3745_v23  ;;  %v4608_v23 = vld [vmem:[#allocation5 + $0x6c4] sm:$0xf0]  ;;  %v4005_v26 = vor.u32 %v4607_v18, %v4004_v17  ;;  %v4009_v27 = vor.u32 %v4591_v19, %v4006_v21  ;;  %v3366_v18 = vld [vmem:[#allocation5 + $0x1c0] sm:$0xf0]  ;;  %v4432_v21 = vld [vmem:[#allocation5 + $0x14c] sm:$0xf] }
  0xb9   : > { %v4013_v28 = vor.u32 %v4608_v23, %v4012_v22  ;;  %v3372_v19 = vld [vmem:[#allocation5 + $0x148] sm:$0xf]  ;;  %v3374_v22 = vld [vmem:[#allocation5 + $0x1c8] sm:$0xf0] }
  0xba   : > { %2183 = vmatpush.bf16.msrb.mxu0 %v3605_v29  ;;  %2196 = vmatpush.bf16.msrb.mxu1 %v3609_v30  ;;  %v3876_v29 = vld [vmem:[#allocation5 + $0x540] sm:$0xf] }
  0xbb   : > { %2209 = vmatpush.bf16.msrb.mxu2 %v3613_v31  ;;  %v4575_v30 = vld [vmem:[#allocation5 + $0x5bc] sm:$0xf0]  ;;  %v4559_v31 = vld [vmem:[#allocation5 + $0x544] sm:$0xf] }
  0xbc   : > { %2222 = vmatpush.bf16.msrb.mxu3 %v3617_v35  ;;  %v4576_v35 = vld [vmem:[#allocation5 + $0x5c4] sm:$0xf0]  ;;  %v3877_v38 = vor.u32 %v4575_v30, %v3876_v29  ;;  %v3881_v39 = vor.u32 %v4559_v31, %v3878_v33  ;;  %v3238_v29 = vld [vmem:[#allocation5 + $0xc0] sm:$0xf0]  ;;  %v3377_v31 = vor.u32 %v4432_v21, %v3374_v22  ;;  %v4400_v33 = vld [vmem:[#allocation5 + $0x4c] sm:$0xf] }
  0xbd   : > { %v3885_v40 = vor.u32 %v4576_v35, %v3884_v34  ;;  %v3244_v30 = vld [vmem:[#allocation5 + $0x48] sm:$0xf]  ;;  %v3246_v34 = vld [vmem:[#allocation5 + $0xc8] sm:$0xf0]  ;;  %v4148_v35 = vld [vmem:[#allocation5 + $0x750] sm:$0xf] }
  0xbe   : > { %2184 = vmatpush.bf16.msrb.mxu0 %v3477_v41  ;;  %2197 = vmatpush.bf16.msrb.mxu1 %v3481_v42  ;;  %v3748_v41 = vld [vmem:[#allocation5 + $0x440] sm:$0xf]  ;;  %v3636_v22 = vld [vmem:[#allocation5 + $0x350] sm:$0xf] }
  0xbf   : > { %2210 = vmatpush.bf16.msrb.mxu2 %v3485_v43  ;;  %v4543_v42 = vld [vmem:[#allocation5 + $0x4bc] sm:$0xf0]  ;;  %v4527_v43 = vld [vmem:[#allocation5 + $0x444] sm:$0xf] }
  0xc0   : > { %2223 = vmatpush.bf16.msrb.mxu3 %v3489_v47  ;;  %v4544_v47 = vld [vmem:[#allocation5 + $0x4c4] sm:$0xf0]  ;;  %v3749_v50 = vor.u32 %v4543_v42, %v3748_v41  ;;  %v3753_v51 = vor.u32 %v4527_v43, %v3750_v45  ;;  %v4642_v41 = vld [vmem:[#allocation5 + $0x7d4] sm:$0xf0]  ;;  %v4158_v45 = vld [vmem:[#allocation5 + $0x7d8] sm:$0xf0] }
  0xc1   : > { %v3757_v52 = vor.u32 %v4544_v47, %v3756_v46  ;;  %v3249_v46 = vor.u32 %v4400_v33, %v3246_v34  ;;  %v4149_v47 = vor.u32 %v4641_v36, %v4148_v35  ;;  %v4498_v33 = vld [vmem:[#allocation5 + $0x35c] sm:$0xf] }
  0xc2   : > { %2185 = vmatpush.bf16.msrb.mxu0 %v3349_v53  ;;  %2198 = vmatpush.bf16.msrb.mxu1 %v3353_v56  ;;  %v3620_v53 = vld [vmem:[#allocation5 + $0x340] sm:$0xf]  ;;  %v3761_v56 = vor.u32 %v4528_v48, %v3758_v49  ;;  %v3646_v34 = vld [vmem:[#allocation5 + $0x3d8] sm:$0xf0] }
  0xc3   : > { %2211 = vmatpush.bf16.msrb.mxu2 %v3357_v57  ;;  %v3622_v57 = vld [vmem:[#allocation5 + $0x3c0] sm:$0xf0]  ;;  %v3621_v62 = vor.u32 %v4511_v54, %v3620_v53  ;;  %v4022_v54 = vld [vmem:[#allocation5 + $0x6d0] sm:$0xf0] }
  0xc4   : > { %2224 = vmatpush.bf16.msrb.mxu3 %v3361_v61  ;;  %v3630_v61 = vld [vmem:[#allocation5 + $0x3c8] sm:$0xf0]  ;;  %v3625_v0 = vor.u32 %v4495_v55, %v3622_v57  ;;  %v4028_v55 = vld [vmem:[#allocation5 + $0x658] sm:$0xf]  ;;  %v4594_v57 = vld [vmem:[#allocation5 + $0x65c] sm:$0xf] }
  0xc5   : > { %v4033_v2 = vor.u32 %v4594_v57, %v4030_v58  ;;  %v3380_v57 = vld [vmem:[#allocation5 + $0x150] sm:$0xf] }
  0xc6   : > { %2186 = vmatpush.bf16.msrb.mxu0 %v3221_v5  ;;  %2199 = vmatpush.bf16.msrb.mxu1 %v3225_v9  ;;  %v3633_v5 = vor.u32 %v4496_v60, %v3630_v61  ;;  %v4464_v9 = vld [vmem:[#allocation5 + $0x24c] sm:$0xf] }
  0xc7   : > { %2212 = vmatpush.bf16.msrb.mxu2 %v3229_v10  ;;  %v3502_v10 = vld [vmem:[#allocation5 + $0x2c8] sm:$0xf0] }
  0xc8   : > { %2225 = vmatpush.bf16.msrb.mxu3 %v3233_v13  ;;  %v3501_v13 = vor.u32 %v4480_v8, %v3500_v7  ;;  %v3505_v17 = vor.u32 %v4464_v9, %v3502_v10  ;;  %v3902_v7 = vld [vmem:[#allocation5 + $0x5d8] sm:$0xf0]  ;;  %v3764_v9 = vld [vmem:[#allocation5 + $0x450] sm:$0xf] }
  0xc9   : > { %2187 = vmatmul.bf16.vlgmr.msrb.gmra.mxu0 %v5297_v63  ;;  %2200 = vmatmul.bf16.vlgmr.msrb.gmra.mxu1 %v5297_v63 }
  0xca   : > { %2231 = vmatpush.bf16.msra.mxu0 %v4133_v14  ;;  %2244 = vmatpush.bf16.msra.mxu1 %v4137_v15  ;;  %v3364_v14 = vld [vmem:[#allocation5 + $0x140] sm:$0xf] }
  0xcb   : > { %2257 = vmatpush.bf16.msra.mxu2 %v4141_v16  ;;  %2226 = vmatmul.bf16.vlgmr.msrb.gmra.mxu3 %v5297_v63  ;;  %v4447_v15 = vld [vmem:[#allocation5 + $0x1bc] sm:$0xf0]  ;;  %v4431_v16 = vld [vmem:[#allocation5 + $0x144] sm:$0xf] }
  0xcc   : > { %2270 = vmatpush.bf16.msra.mxu3 %v4145_v20  ;;  %2213 = vmatmul.bf16.vlgmr.msrb.gmra.mxu2 %v5297_v63  ;;  %v4448_v20 = vld [vmem:[#allocation5 + $0x1c4] sm:$0xf0]  ;;  %v3365_v23 = vor.u32 %v4447_v15, %v3364_v14  ;;  %v5319_v14 = vld [vmem:[#allocation7] sm:$0xff]  ;;  %v3905_v15 = vor.u32 %v4562_v6, %v3902_v7  ;;  %v4434_v7 = vld [vmem:[#allocation5 + $0x15c] sm:$0xf] }
  0xce   : > { %2232 = vmatpush.bf16.msra.mxu0 %v4005_v26  ;;  %2245 = vmatpush.bf16.msra.mxu1 %v4009_v27  ;;  %v3369_v26 = vor.u32 %v4431_v16, %v3366_v18  ;;  %v3373_v27 = vor.u32 %v4448_v20, %v3372_v19  ;;  %v3766_v16 = vld [vmem:[#allocation5 + $0x4d0] sm:$0xf0]  ;;  %v4546_v18 = vld [vmem:[#allocation5 + $0x4d4] sm:$0xf0]  ;;  %v4530_v19 = vld [vmem:[#allocation5 + $0x45c] sm:$0xf] }
  0xcf   : > { %2258 = vmatpush.bf16.msra.mxu2 %v4013_v28  ;;  %v4399_v28 = vld [vmem:[#allocation5 + $0x44] sm:$0xf]  ;;  %v3774_v20 = vld [vmem:[#allocation5 + $0x4d8] sm:$0xf0] }
  0xd0   : > { %2271 = vmatpush.bf16.msra.mxu3 %v4017_v32  ;;  %v4416_v32 = vld [vmem:[#allocation5 + $0xc4] sm:$0xf0]  ;;  %v3241_v42 = vor.u32 %v4399_v28, %v3238_v29  ;;  %v680_v28 = vperm.slane %v5319_v14, 1  ;;  %v3777_v29 = vor.u32 %v4530_v19, %v3774_v20  ;;  %v3254_v20 = vld [vmem:[#allocation5 + $0xd0] sm:$0xf0] }
  0xd1   : > { %v3245_v43 = vor.u32 %v4416_v32, %v3244_v30  ;;  %v3638_v30 = vld [vmem:[#allocation5 + $0x3d0] sm:$0xf0]  ;;  %v4514_v32 = vld [vmem:[#allocation5 + $0x3d4] sm:$0xf0] }
  0xd2   : > { %2233 = vmatpush.bf16.msra.mxu0 %v3877_v38  ;;  %2246 = vmatpush.bf16.msra.mxu1 %v3881_v39  ;;  %v3237_v38 = vor.u32 %v4415_v25, %v3236_v24  ;;  %v4150_v39 = vld [vmem:[#allocation5 + $0x7d0] sm:$0xf0] }
  0xd3   : > { %2259 = vmatpush.bf16.msra.mxu2 %v3885_v40  ;;  %v4156_v40 = vld [vmem:[#allocation5 + $0x758] sm:$0xf]  ;;  %v4153_v48 = vor.u32 %v4625_v37, %v4150_v39  ;;  %v3508_v37 = vld [vmem:[#allocation5 + $0x250] sm:$0xf] }
  0xd4   : > { %2272 = vmatpush.bf16.msra.mxu3 %v3889_v44  ;;  %v4626_v44 = vld [vmem:[#allocation5 + $0x75c] sm:$0xf]  ;;  %v4157_v49 = vor.u32 %v4642_v41, %v4156_v40  ;;  %v681_v40 = vperm.slane %v5319_v14, 2 }
  0xd5   : > { %v4161_v53 = vor.u32 %v4626_v44, %v4158_v45  ;;  %v4465_v44 = vld [vmem:[#allocation5 + $0x254] sm:$0xf] }
  0xd6   : > { %2234 = vmatpush.bf16.msra.mxu0 %v3749_v50  ;;  %2247 = vmatpush.bf16.msra.mxu1 %v3753_v51  ;;  %v4020_v50 = vld [vmem:[#allocation5 + $0x650] sm:$0xf]  ;;  %v3510_v45 = vld [vmem:[#allocation5 + $0x2d0] sm:$0xf0] }
  0xd7   : > { %2260 = vmatpush.bf16.msra.mxu2 %v3757_v52  ;;  %v4609_v51 = vld [vmem:[#allocation5 + $0x6cc] sm:$0xf0]  ;;  %v4593_v52 = vld [vmem:[#allocation5 + $0x654] sm:$0xf] }
  0xd8   : > { %2273 = vmatpush.bf16.msra.mxu3 %v3761_v56  ;;  %v4610_v56 = vld [vmem:[#allocation5 + $0x6d4] sm:$0xf0]  ;;  %v4021_v59 = vor.u32 %v4609_v51, %v4020_v50  ;;  %v4025_v60 = vor.u32 %v4593_v52, %v4022_v54  ;;  %v4466_v51 = vld [vmem:[#allocation5 + $0x25c] sm:$0xf] }
  0xd9   : > { %v4029_v61 = vor.u32 %v4610_v56, %v4028_v55  ;;  %v3518_v52 = vld [vmem:[#allocation5 + $0x2d8] sm:$0xf0]  ;;  %v682_v55 = vperm.slane %v5319_v14, 3 }
  0xda   : > { %2235 = vmatpush.bf16.msra.mxu0 %v3621_v62  ;;  %2248 = vmatpush.bf16.msra.mxu1 %v3625_v0  ;;  %v3892_v62 = vld [vmem:[#allocation5 + $0x550] sm:$0xf] }
  0xdb   : > { %2261 = vmatpush.bf16.msra.mxu2 %v3629_v1  ;;  %v4577_v0 = vld [vmem:[#allocation5 + $0x5cc] sm:$0xf0]  ;;  %v4561_v1 = vld [vmem:[#allocation5 + $0x554] sm:$0xf] }
  0xdc   : > { %2274 = vmatpush.bf16.msra.mxu3 %v3633_v5  ;;  %v4578_v5 = vld [vmem:[#allocation5 + $0x5d4] sm:$0xf0]  ;;  %v3893_v8 = vor.u32 %v4577_v0, %v3892_v62  ;;  %v3897_v10 = vor.u32 %v4561_v1, %v3894_v3  ;;  %v4433_v62 = vld [vmem:[#allocation5 + $0x154] sm:$0xf] }
  0xdd   : > { %v3382_v0 = vld [vmem:[#allocation5 + $0x1d0] sm:$0xf0]  ;;  %v3388_v3 = vld [vmem:[#allocation5 + $0x158] sm:$0xf] }
  0xde   : > { %2236 = vmatpush.bf16.msra.mxu0 %v3493_v11  ;;  %2249 = vmatpush.bf16.msra.mxu1 %v3497_v12  ;;  %v3901_v11 = vor.u32 %v4578_v5, %v3900_v4  ;;  %v4545_v12 = vld [vmem:[#allocation5 + $0x4cc] sm:$0xf0]  ;;  %v4450_v4 = vld [vmem:[#allocation5 + $0x1d4] sm:$0xf0] }
  0xdf   : > { %2262 = vmatpush.bf16.msra.mxu2 %v3501_v13  ;;  %v4529_v13 = vld [vmem:[#allocation5 + $0x454] sm:$0xf]  ;;  %v3765_v21 = vor.u32 %v4545_v12, %v3764_v9  ;;  %v3252_v12 = vld [vmem:[#allocation5 + $0x50] sm:$0xf]  ;;  %v3389_v19 = vor.u32 %v4450_v4, %v3388_v3  ;;  %v3780_v4 = vld [vmem:[#allocation5 + $0x460] sm:$0xf] }
  0xe0   : > { %2275 = vmatpush.bf16.msra.mxu3 %v3505_v17  ;;  %v3772_v17 = vld [vmem:[#allocation5 + $0x458] sm:$0xf]  ;;  %v3769_v24 = vor.u32 %v4529_v13, %v3766_v16  ;;  %v4417_v13 = vld [vmem:[#allocation5 + $0xcc] sm:$0xf0] }
  0xe1   : > { %v3773_v25 = vor.u32 %v4546_v18, %v3772_v17  ;;  %v3385_v18 = vor.u32 %v4433_v62, %v3382_v0  ;;  %v3916_v62 = vld [vmem:[#allocation5 + $0x568] sm:$0xf] }
  0xe2   : > { %2237 = vmatpush.bf16.msra.mxu0 %v3365_v23  ;;  %2250 = vmatpush.bf16.msra.mxu1 %v3369_v26  ;;  %v679_v23 = vperm.slane %v5319_v14, 0  ;;  %v4513_v26 = vld [vmem:[#allocation5 + $0x3cc] sm:$0xf0]  ;;  %v4580_v0 = vld [vmem:[#allocation5 + $0x5e4] sm:$0xf0] }
  0xe3   : > { %2263 = vmatpush.bf16.msra.mxu2 %v3373_v27  ;;  %v4497_v27 = vld [vmem:[#allocation5 + $0x354] sm:$0xf]  ;;  %v3637_v36 = vor.u32 %v4513_v26, %v3636_v22  ;;  %v3262_v26 = vld [vmem:[#allocation5 + $0xd8] sm:$0xf0] }
  0xe4   : > { %2276 = vmatpush.bf16.msra.mxu3 %v3377_v31  ;;  %v3644_v31 = vld [vmem:[#allocation5 + $0x358] sm:$0xf]  ;;  %v3641_v41 = vor.u32 %v4497_v27, %v3638_v30  ;;  %v4164_v27 = vld [vmem:[#allocation5 + $0x760] sm:$0xf] }
  0xe6   : > { %2238 = vmatpush.bf16.msra.mxu0 %v3237_v38  ;;  %2251 = vmatpush.bf16.msra.mxu1 %v3241_v42  ;;  %v2032_v35 = vpop.f32.mrf.mxu0  ;;  %v2045_v39 = vpop.f32.mrf.mxu1  ;;  %v3645_v42 = vor.u32 %v4514_v32, %v3644_v31  ;;  %v3253_v32 = vor.u32 %v4417_v13, %v3252_v12  ;;  %v3788_v12 = vld [vmem:[#allocation5 + $0x468] sm:$0xf] }
  0xe7   : > { %2264 = vmatpush.bf16.msra.mxu2 %v3245_v43  ;;  %v2033_v38 = vadd.f32 %v2032_v35, %v679_v23  ;;  %v4481_v43 = vld [vmem:[#allocation5 + $0x2cc] sm:$0xf0]  ;;  %v4644_v35 = vld [vmem:[#allocation5 + $0x7e4] sm:$0xf0] }
  0xe8   : > { %2277 = vmatpush.bf16.msra.mxu3 %v3249_v46  ;;  %v2046_v46 = vadd.f32 %v2045_v39, %v680_v28  ;;  %v3509_v56 = vor.u32 %v4481_v43, %v3508_v37  ;;  %v4643_v28 = vld [vmem:[#allocation5 + $0x7dc] sm:$0xf0]  ;;  %v4174_v39 = vld [vmem:[#allocation5 + $0x7e8] sm:$0xf0]  ;;  %v4548_v13 = vld [vmem:[#allocation5 + $0x4e4] sm:$0xf0] }
  0xe9   : > { %2239 = vmatmul.bf16.vlgmr.msra.gmra.mxu0 %v5297_v63  ;;  %2252 = vmatmul.bf16.vlgmr.msra.gmra.mxu1 %v5297_v63  ;;  %v2439_v50 = vmax.f32 %v2033_v38, 0.0  ;;  %v4628_v38 = vld [vmem:[#allocation5 + $0x76c] sm:$0xf] }
  0xea   : > { %2283 = vmatpush.bf16.msrb.mxu0 %v4149_v47  ;;  %2296 = vmatpush.bf16.msrb.mxu1 %v4153_v48  ;;  %v3649_v47 = vor.u32 %v4498_v33, %v3646_v34  ;;  %v3516_v48 = vld [vmem:[#allocation5 + $0x258] sm:$0xf]  ;;  %v4166_v33 = vld [vmem:[#allocation5 + $0x7e0] sm:$0xf0]  ;;  %v4172_v34 = vld [vmem:[#allocation5 + $0x768] sm:$0xf] }
  0xeb   : > { %2309 = vmatpush.bf16.msrb.mxu2 %v4157_v49  ;;  %2278 = vmatmul.bf16.vlgmr.msra.gmra.mxu3 %v5297_v63  ;;  %v4482_v49 = vld [vmem:[#allocation5 + $0x2d4] sm:$0xf0] }
  0xec   : > { %2322 = vmatpush.bf16.msrb.mxu3 %v4161_v53  ;;  %2265 = vmatmul.bf16.vlgmr.msra.gmra.mxu2 %v5297_v63  ;;  %v2440_v53 = vmax.f32 %v2046_v46, 0.0  ;;  %v4611_v46 = vld [vmem:[#allocation5 + $0x6dc] sm:$0xf0] }
  0xee   : > { %2284 = vmatpush.bf16.msrb.mxu0 %v4021_v59  ;;  %2297 = vmatpush.bf16.msrb.mxu1 %v4025_v60  ;;  %v3513_v59 = vor.u32 %v4465_v44, %v3510_v45  ;;  %v3517_v60 = vor.u32 %v4482_v49, %v3516_v48  ;;  %v2471_v1 = vmax.f32 %v2439_v50, %v2440_v53  ;;  %v2071_v6 = vpop.f32.mrf.mxu3  ;;  %v2047_v17 = vpop.f32.mrf.mxu1  ;;  %v4036_v45 = vld [vmem:[#allocation5 + $0x660] sm:$0xf]  ;;  %v4038_v49 = vld [vmem:[#allocation5 + $0x6e0] sm:$0xf0]  ;;  %v4044_v50 = vld [vmem:[#allocation5 + $0x668] sm:$0xf] }
  0xef   : > { %2310 = vmatpush.bf16.msrb.mxu2 %v4029_v61  ;;  %v2058_v54 = vpop.f32.mrf.mxu2  ;;  %v4449_v61 = vld [vmem:[#allocation5 + $0x1cc] sm:$0xf0]  ;;  %v2072_v9 = vadd.f32 %v2071_v6, %v682_v55  ;;  %v4173_v44 = vor.u32 %v4644_v35, %v4172_v34  ;;  %v4177_v48 = vor.u32 %v4628_v38, %v4174_v39  ;;  %v4046_v53 = vld [vmem:[#allocation5 + $0x6e8] sm:$0xf0] }
  0xf0   : > { %2323 = vmatpush.bf16.msrb.mxu3 %v4033_v2  ;;  %v2059_v58 = vadd.f32 %v2058_v54, %v681_v40  ;;  %v3521_v2 = vor.u32 %v4466_v51, %v3518_v52  ;;  %v4612_v51 = vld [vmem:[#allocation5 + $0x6e4] sm:$0xf0]  ;;  %v4596_v52 = vld [vmem:[#allocation5 + $0x66c] sm:$0xf]  ;;  %v4037_v54 = vor.u32 %v4611_v46, %v4036_v45  ;;  %v4467_v45 = vld [vmem:[#allocation5 + $0x264] sm:$0xf] }
  0xf1   : > { %v2442_v22 = vmax.f32 %v2072_v9, 0.0  ;;  %v3782_v9 = vld [vmem:[#allocation5 + $0x4e0] sm:$0xf0]  ;;  %v3790_v17 = vld [vmem:[#allocation5 + $0x4e8] sm:$0xf0] }
  0xf2   : > { %2285 = vmatpush.bf16.msrb.mxu0 %v3893_v8  ;;  %2298 = vmatpush.bf16.msrb.mxu1 %v3897_v10  ;;  %v2441_v5 = vmax.f32 %v2059_v58, 0.0  ;;  %v3390_v8 = vld [vmem:[#allocation5 + $0x1d8] sm:$0xf0]  ;;  %v2034_v10 = vpop.f32.mrf.mxu0  ;;  %v4579_v58 = vld [vmem:[#allocation5 + $0x5dc] sm:$0xf0] }
  0xf3   : > { %2311 = vmatpush.bf16.msrb.mxu2 %v3901_v11  ;;  %v3381_v11 = vor.u32 %v4449_v61, %v3380_v57  ;;  %v3393_v23 = vor.u32 %v4434_v7, %v3390_v8  ;;  %v3908_v57 = vld [vmem:[#allocation5 + $0x560] sm:$0xf]  ;;  %v3910_v61 = vld [vmem:[#allocation5 + $0x5e0] sm:$0xf0]  ;;  %v3917_v7 = vor.u32 %v4580_v0, %v3916_v62  ;;  %v683_v10 = vperm.slane %v5319_v14, 4 }
  0xf4   : > { %2324 = vmatpush.bf16.msrb.mxu3 %v3905_v15  ;;  %v4401_v15 = vld [vmem:[#allocation5 + $0x54] sm:$0xf]  ;;  %v2472_v16 = vmax.f32 %v2471_v1, %v2441_v5  ;;  %v4564_v1 = vld [vmem:[#allocation5 + $0x56c] sm:$0xf]  ;;  %v3909_v3 = vor.u32 %v4579_v58, %v3908_v57  ;;  %v4547_v5 = vld [vmem:[#allocation5 + $0x4dc] sm:$0xf0] }
  0xf5   : > { %v4531_v8 = vld [vmem:[#allocation5 + $0x464] sm:$0xf]  ;;  %v4500_v34 = vld [vmem:[#allocation5 + $0x36c] sm:$0xf]  ;;  %v3396_v58 = vld [vmem:[#allocation5 + $0x160] sm:$0xf] }
  0xf6   : > { %2286 = vmatpush.bf16.msrb.mxu0 %v3765_v21  ;;  %2299 = vmatpush.bf16.msrb.mxu1 %v3769_v24  ;;  %v3260_v21 = vld [vmem:[#allocation5 + $0x58] sm:$0xf]  ;;  %v5325_v30 = vmax.f32 %v2472_v16, %v2442_v22  ;;  %v4532_v16 = vld [vmem:[#allocation5 + $0x46c] sm:$0xf]  ;;  %v3789_v22 = vor.u32 %v4548_v13, %v3788_v12  ;;  %v4451_v62 = vld [vmem:[#allocation5 + $0x1dc] sm:$0xf0] }
  0xf7   : > { %2312 = vmatpush.bf16.msrb.mxu2 %v3773_v25  ;;  %v4418_v24 = vld [vmem:[#allocation5 + $0xd4] sm:$0xf0]  ;;  %v4402_v25 = vld [vmem:[#allocation5 + $0x5c] sm:$0xf]  ;;  %v2060_v31 = vpop.f32.mrf.mxu2  ;;  %v3662_v35 = vld [vmem:[#allocation5 + $0x3e8] sm:$0xf0] }
  0xf8   : > { %2325 = vmatpush.bf16.msrb.mxu3 %v3777_v29  ;;  %v4627_v29 = vld [vmem:[#allocation5 + $0x764] sm:$0xf]  ;;  %v3261_v37 = vor.u32 %v4418_v24, %v3260_v21  ;;  %v3265_v40 = vor.u32 %v4402_v25, %v3262_v26  ;;  %v3785_v21 = vor.u32 %v4531_v8, %v3782_v9  ;;  %v4516_v31 = vld [vmem:[#allocation5 + $0x3e4] sm:$0xf0]  ;;  %v3406_v8 = vld [vmem:[#allocation5 + $0x1e8] sm:$0xf0] }
  0xf9   : > { %v4169_v43 = vor.u32 %v4627_v29, %v4166_v33  ;;  %v4499_v24 = vld [vmem:[#allocation5 + $0x364] sm:$0xf]  ;;  %v3660_v29 = vld [vmem:[#allocation5 + $0x368] sm:$0xf]  ;;  %v685_v33 = vperm.slane %v5319_v14, 6 }
  0xfa   : > { %2287 = vmatpush.bf16.msrb.mxu0 %v3637_v36  ;;  %2300 = vmatpush.bf16.msrb.mxu1 %v3641_v41  ;;  %v3257_v36 = vor.u32 %v4401_v15, %v3254_v20  ;;  %v4165_v41 = vor.u32 %v4643_v28, %v4164_v27  ;;  %v684_v15 = vperm.slane %v5319_v14, 5  ;;  %v3654_v25 = vld [vmem:[#allocation5 + $0x3e0] sm:$0xf0]  ;;  %v3793_v28 = vor.u32 %v4532_v16, %v3790_v17  ;;  %v4419_v12 = vld [vmem:[#allocation5 + $0xdc] sm:$0xf0] }
  0xfb   : > { %2313 = vmatpush.bf16.msrb.mxu2 %v3645_v42  ;;  %v2073_v42 = vpop.f32.mrf.mxu3  ;;  %v4435_v0 = vld [vmem:[#allocation5 + $0x164] sm:$0xf] }
  0xfc   : > { %2326 = vmatpush.bf16.msrb.mxu3 %v3649_v47  ;;  %v4595_v47 = vld [vmem:[#allocation5 + $0x664] sm:$0xf] }
  0xfd   : > { %v4041_v55 = vor.u32 %v4595_v47, %v4038_v49  ;;  %v3665_v47 = vor.u32 %v4500_v34, %v3662_v35  ;;  %v3532_v49 = vld [vmem:[#allocation5 + $0x268] sm:$0xf]  ;;  %v4403_v16 = vld [vmem:[#allocation5 + $0x64] sm:$0xf]  ;;  %v4630_v35 = vld [vmem:[#allocation5 + $0x77c] sm:$0xf] }
  0xfe   : > { %2288 = vmatpush.bf16.msrb.mxu0 %v3509_v56  ;;  %2301 = vmatpush.bf16.msrb.mxu1 %v3513_v59  ;;  %v4045_v56 = vor.u32 %v4612_v51, %v4044_v50  ;;  %v4563_v59 = vld [vmem:[#allocation5 + $0x564] sm:$0xf]  ;;  %v4484_v50 = vld [vmem:[#allocation5 + $0x2e4] sm:$0xf0] }
  0xff   : > { %2314 = vmatpush.bf16.msrb.mxu2 %v3517_v60  ;;  %v4049_v60 = vor.u32 %v4596_v52, %v4046_v53  ;;  %v3913_v6 = vor.u32 %v4563_v59, %v3910_v61  ;;  %v4468_v53 = vld [vmem:[#allocation5 + $0x26c] sm:$0xf]  ;;  %v3270_v17 = vld [vmem:[#allocation5 + $0xe0] sm:$0xf0] }
 0x100   : > { %2327 = vmatpush.bf16.msrb.mxu3 %v3521_v2  ;;  %v3918_v2 = vld [vmem:[#allocation5 + $0x5e8] sm:$0xf0] }
 0x102   : > { %2289 = vmatpush.bf16.msrb.mxu0 %v3381_v11  ;;  %2302 = vmatpush.bf16.msrb.mxu1 %v3385_v18  ;;  %v3921_v11 = vor.u32 %v4564_v1, %v3918_v2  ;;  %v3781_v18 = vor.u32 %v4547_v5, %v3780_v4  ;;  %v3398_v4 = vld [vmem:[#allocation5 + $0x1e0] sm:$0xf0]  ;;  %v3404_v5 = vld [vmem:[#allocation5 + $0x168] sm:$0xf] }
 0x103   : > { %2315 = vmatpush.bf16.msrb.mxu2 %v3389_v19  ;;  %v3652_v19 = vld [vmem:[#allocation5 + $0x360] sm:$0xf]  ;;  %v3401_v13 = vor.u32 %v4435_v0, %v3398_v4  ;;  %v3796_v0 = vld [vmem:[#allocation5 + $0x470] sm:$0xf]  ;;  %v4533_v4 = vld [vmem:[#allocation5 + $0x474] sm:$0xf] }
 0x104   : > { %2328 = vmatpush.bf16.msrb.mxu3 %v3393_v23  ;;  %v4515_v23 = vld [vmem:[#allocation5 + $0x3dc] sm:$0xf0] }
 0x105   : > { %v3653_v38 = vor.u32 %v4515_v23, %v3652_v19  ;;  %v3278_v23 = vld [vmem:[#allocation5 + $0xe8] sm:$0xf0] }
 0x106   : > { %2290 = vmatpush.bf16.msrb.mxu0 %v3253_v32  ;;  %2303 = vmatpush.bf16.msrb.mxu1 %v3257_v36  ;;  %v2084_v20 = vpop.f32.mrf.mxu0  ;;  %v2097_v27 = vpop.f32.mrf.mxu1 }
 0x107   : > { %2316 = vmatpush.bf16.msrb.mxu2 %v3261_v37  ;;  %v2085_v26 = vadd.f32 %v2084_v20, %v683_v10  ;;  %v2098_v32 = vadd.f32 %v2097_v27, %v684_v15  ;;  %v686_v37 = vperm.slane %v5319_v14, 7  ;;  %v3397_v10 = vor.u32 %v4451_v62, %v3396_v58  ;;  %v4629_v27 = vld [vmem:[#allocation5 + $0x774] sm:$0xf]  ;;  %v3932_v58 = vld [vmem:[#allocation5 + $0x578] sm:$0xf] }
 0x108   : > { %2329 = vmatpush.bf16.msrb.mxu3 %v3265_v40  ;;  %v3657_v40 = vor.u32 %v4499_v24, %v3654_v25  ;;  %v4180_v25 = vld [vmem:[#allocation5 + $0x770] sm:$0xf] }
 0x109   : > { %2291 = vmatmul.bf16.vlgmr.msrb.gmra.mxu0 %v5297_v63  ;;  %2304 = vmatmul.bf16.vlgmr.msrb.gmra.mxu1 %v5297_v63  ;;  %v2443_v36 = vmax.f32 %v2085_v26, 0.0  ;;  %v2444_v39 = vmax.f32 %v2098_v32, 0.0  ;;  %v4645_v26 = vld [vmem:[#allocation5 + $0x7ec] sm:$0xf0]  ;;  %v4646_v32 = vld [vmem:[#allocation5 + $0x7f4] sm:$0xf0] }
 0x10a   : > { %2335 = vmatpush.bf16.msra.mxu0 %v4165_v41  ;;  %2348 = vmatpush.bf16.msra.mxu1 %v4169_v43  ;;  %v3661_v41 = vor.u32 %v4516_v31, %v3660_v29  ;;  %v3524_v43 = vld [vmem:[#allocation5 + $0x260] sm:$0xf]  ;;  %v4182_v29 = vld [vmem:[#allocation5 + $0x7f0] sm:$0xf0]  ;;  %v4188_v31 = vld [vmem:[#allocation5 + $0x778] sm:$0xf] }
 0x10b   : > { %2361 = vmatpush.bf16.msra.mxu2 %v4173_v44  ;;  %2330 = vmatmul.bf16.vlgmr.msrb.gmra.mxu3 %v5297_v63  ;;  %v2474_v42 = vmax.f32 %v5325_v30, %v2443_v36  ;;  %v4483_v44 = vld [vmem:[#allocation5 + $0x2dc] sm:$0xf0]  ;;  %v4190_v36 = vld [vmem:[#allocation5 + $0x7f8] sm:$0xf0] }
 0x10c   : > { %2374 = vmatpush.bf16.msra.mxu3 %v4177_v48  ;;  %2317 = vmatmul.bf16.vlgmr.msrb.gmra.mxu2 %v5297_v63  ;;  %v3526_v48 = vld [vmem:[#allocation5 + $0x2e0] sm:$0xf0] }
 0x10d   : > { %v2475_v52 = vmax.f32 %v2474_v42, %v2444_v39  ;;  %v3529_v59 = vor.u32 %v4467_v45, %v3526_v48  ;;  %v4185_v39 = vor.u32 %v4629_v27, %v4182_v29  ;;  %v4613_v42 = vld [vmem:[#allocation5 + $0x6ec] sm:$0xf0]  ;;  %v4054_v45 = vld [vmem:[#allocation5 + $0x6f0] sm:$0xf0]  ;;  %v4598_v48 = vld [vmem:[#allocation5 + $0x67c] sm:$0xf] }
 0x10e   : > { %2336 = vmatpush.bf16.msra.mxu0 %v4037_v54  ;;  %2349 = vmatpush.bf16.msra.mxu1 %v4041_v55  ;;  %v2123_v14 = vpop.f32.mrf.mxu3  ;;  %v3534_v54 = vld [vmem:[#allocation5 + $0x2e8] sm:$0xf0]  ;;  %v2086_v30 = vpop.f32.mrf.mxu0  ;;  %v3676_v27 = vld [vmem:[#allocation5 + $0x378] sm:$0xf] }
 0x10f   : > { %2362 = vmatpush.bf16.msra.mxu2 %v4045_v56  ;;  %v2110_v46 = vpop.f32.mrf.mxu2  ;;  %v2124_v55 = vadd.f32 %v2123_v14, %v686_v37  ;;  %v3525_v56 = vor.u32 %v4483_v44, %v3524_v43  ;;  %v2099_v1 = vpop.f32.mrf.mxu1  ;;  %v3537_v2 = vor.u32 %v4468_v53, %v3534_v54  ;;  %v4597_v43 = vld [vmem:[#allocation5 + $0x674] sm:$0xf]  ;;  %v4193_v44 = vor.u32 %v4630_v35, %v4190_v36  ;;  %v4581_v53 = vld [vmem:[#allocation5 + $0x5ec] sm:$0xf0]  ;;  %v4582_v30 = vld [vmem:[#allocation5 + $0x5f4] sm:$0xf0] }
 0x110   : > { %2375 = vmatpush.bf16.msra.mxu3 %v4049_v60  ;;  %v2111_v51 = vadd.f32 %v2110_v46, %v685_v33  ;;  %v3533_v60 = vor.u32 %v4484_v50, %v3532_v49  ;;  %v3273_v33 = vor.u32 %v4403_v16, %v3270_v17  ;;  %v4060_v46 = vld [vmem:[#allocation5 + $0x678] sm:$0xf]  ;;  %v4062_v49 = vld [vmem:[#allocation5 + $0x6f8] sm:$0xf0]  ;;  %v4057_v14 = vor.u32 %v4597_v43, %v4054_v45  ;;  %v4565_v54 = vld [vmem:[#allocation5 + $0x574] sm:$0xf] }
 0x111   : > { %v2446_v61 = vmax.f32 %v2124_v55, 0.0  ;;  %v5338_v55 = vld [vmem:[#allocation7 + $0x8] sm:$0xff]  ;;  %v3542_v45 = vld [vmem:[#allocation5 + $0x2f0] sm:$0xf0] }
 0x112   : > { %2337 = vmatpush.bf16.msra.mxu0 %v3909_v3  ;;  %2350 = vmatpush.bf16.msra.mxu1 %v3913_v6  ;;  %v2445_v57 = vmax.f32 %v2111_v51, 0.0  ;;  %v4452_v6 = vld [vmem:[#allocation5 + $0x1e4] sm:$0xf0]  ;;  %v3924_v51 = vld [vmem:[#allocation5 + $0x570] sm:$0xf]  ;;  %v687_v62 = vperm.slane %v5338_v55, 0 }
 0x113   : > { %2363 = vmatpush.bf16.msra.mxu2 %v3917_v7  ;;  %v4436_v7 = vld [vmem:[#allocation5 + $0x16c] sm:$0xf]  ;;  %v3405_v15 = vor.u32 %v4452_v6, %v3404_v5  ;;  %v688_v5 = vperm.slane %v5338_v55, 1  ;;  %v690_v36 = vperm.slane %v5338_v55, 3 }
 0x114   : > { %2376 = vmatpush.bf16.msra.mxu3 %v3921_v11  ;;  %v2476_v3 = vmax.f32 %v2475_v52, %v2445_v57  ;;  %v3268_v11 = vld [vmem:[#allocation5 + $0x60] sm:$0xf]  ;;  %v3409_v20 = vor.u32 %v4436_v7, %v3406_v8  ;;  %v3926_v57 = vld [vmem:[#allocation5 + $0x5f0] sm:$0xf0]  ;;  %v3804_v8 = vld [vmem:[#allocation5 + $0x478] sm:$0xf] }
 0x115   : > { %v3929_v1 = vor.u32 %v4565_v54, %v3926_v57  ;;  %v3798_v7 = vld [vmem:[#allocation5 + $0x4f0] sm:$0xf0]  ;;  %v4453_v54 = vld [vmem:[#allocation5 + $0x1ec] sm:$0xf0] }
 0x116   : > { %2338 = vmatpush.bf16.msra.mxu0 %v3781_v18  ;;  %2351 = vmatpush.bf16.msra.mxu1 %v3785_v21  ;;  %v5336_v9 = vmax.f32 %v2476_v3, %v2446_v61  ;;  %v3276_v18 = vld [vmem:[#allocation5 + $0x68] sm:$0xf]  ;;  %v2125_v24 = vpop.f32.mrf.mxu3  ;;  %v3925_v61 = vor.u32 %v4581_v53, %v3924_v51  ;;  %v4549_v3 = vld [vmem:[#allocation5 + $0x4ec] sm:$0xf0] }
 0x117   : > { %2364 = vmatpush.bf16.msra.mxu2 %v3789_v22  ;;  %v2112_v19 = vpop.f32.mrf.mxu2  ;;  %v4420_v21 = vld [vmem:[#allocation5 + $0xe4] sm:$0xf0]  ;;  %v4404_v22 = vld [vmem:[#allocation5 + $0x6c] sm:$0xf]  ;;  %v3797_v16 = vor.u32 %v4549_v3, %v3796_v0  ;;  %v3670_v24 = vld [vmem:[#allocation5 + $0x3f0] sm:$0xf0] }
 0x118   : > { %2377 = vmatpush.bf16.msra.mxu3 %v3793_v28  ;;  %v3269_v28 = vor.u32 %v4419_v12, %v3268_v11  ;;  %v3277_v34 = vor.u32 %v4420_v21, %v3276_v18  ;;  %v3281_v37 = vor.u32 %v4404_v22, %v3278_v23  ;;  %v4534_v12 = vld [vmem:[#allocation5 + $0x47c] sm:$0xf]  ;;  %v3668_v18 = vld [vmem:[#allocation5 + $0x370] sm:$0xf]  ;;  %v3801_v19 = vor.u32 %v4533_v4, %v3798_v7  ;;  %v4501_v23 = vld [vmem:[#allocation5 + $0x374] sm:$0xf] }
 0x119   : > { %v4517_v22 = vld [vmem:[#allocation5 + $0x3ec] sm:$0xf0]  ;;  %v3420_v0 = vld [vmem:[#allocation5 + $0x178] sm:$0xf]  ;;  %v4438_v3 = vld [vmem:[#allocation5 + $0x17c] sm:$0xf] }
 0x11a   : > { %2339 = vmatpush.bf16.msra.mxu0 %v3653_v38  ;;  %2352 = vmatpush.bf16.msra.mxu1 %v3657_v40  ;;  %v4181_v38 = vor.u32 %v4645_v26, %v4180_v25  ;;  %v4189_v40 = vor.u32 %v4646_v32, %v4188_v31  ;;  %v4502_v31 = vld [vmem:[#allocation5 + $0x37c] sm:$0xf]  ;;  %v3669_v35 = vor.u32 %v4517_v22, %v3668_v18  ;;  %v3412_v53 = vld [vmem:[#allocation5 + $0x170] sm:$0xf] }
 0x11b   : > { %2365 = vmatpush.bf16.msra.mxu2 %v3661_v41  ;;  %v4052_v41 = vld [vmem:[#allocation5 + $0x670] sm:$0xf]  ;;  %v3678_v32 = vld [vmem:[#allocation5 + $0x3f8] sm:$0xf0] }
 0x11c   : > { %2378 = vmatpush.bf16.msra.mxu3 %v3665_v47  ;;  %v4614_v47 = vld [vmem:[#allocation5 + $0x6f4] sm:$0xf0]  ;;  %v4053_v50 = vor.u32 %v4613_v42, %v4052_v41  ;;  %v4469_v41 = vld [vmem:[#allocation5 + $0x274] sm:$0xf]  ;;  %v3681_v43 = vor.u32 %v4502_v31, %v3678_v32  ;;  %v3422_v4 = vld [vmem:[#allocation5 + $0x1f8] sm:$0xf0] }
 0x11d   : > { %v4061_v52 = vor.u32 %v4614_v47, %v4060_v46  ;;  %v3548_v46 = vld [vmem:[#allocation5 + $0x278] sm:$0xf] }
 0x11e   : > { %2340 = vmatpush.bf16.msra.mxu0 %v3525_v56  ;;  %2353 = vmatpush.bf16.msra.mxu1 %v3529_v59  ;;  %v4065_v56 = vor.u32 %v4598_v48, %v4062_v49  ;;  %v4566_v59 = vld [vmem:[#allocation5 + $0x57c] sm:$0xf]  ;;  %v4486_v47 = vld [vmem:[#allocation5 + $0x2f4] sm:$0xf0] }
 0x11f   : > { %2366 = vmatpush.bf16.msra.mxu2 %v3533_v60  ;;  %v3934_v60 = vld [vmem:[#allocation5 + $0x5f8] sm:$0xf0] }
 0x120   : > { %2379 = vmatpush.bf16.msra.mxu3 %v3537_v2  ;;  %v3933_v2 = vor.u32 %v4582_v30, %v3932_v58  ;;  %v3937_v6 = vor.u32 %v4566_v59, %v3934_v60  ;;  %v4470_v49 = vld [vmem:[#allocation5 + $0x27c] sm:$0xf]  ;;  %v3545_v58 = vor.u32 %v4469_v41, %v3542_v45  ;;  %v3549_v30 = vor.u32 %v4486_v47, %v3548_v46  ;;  %v4437_v59 = vld [vmem:[#allocation5 + $0x174] sm:$0xf] }
 0x121   : > { %v3414_v60 = vld [vmem:[#allocation5 + $0x1f0] sm:$0xf0] }
 0x122   : > { %2341 = vmatpush.bf16.msra.mxu0 %v3397_v10  ;;  %2354 = vmatpush.bf16.msra.mxu1 %v3401_v13  ;;  %v4550_v10 = vld [vmem:[#allocation5 + $0x4f4] sm:$0xf0]  ;;  %v3806_v13 = vld [vmem:[#allocation5 + $0x4f8] sm:$0xf0]  ;;  %v3417_v7 = vor.u32 %v4437_v59, %v3414_v60 }
 0x123   : > { %2367 = vmatpush.bf16.msra.mxu2 %v3405_v15  ;;  %v3809_v26 = vor.u32 %v4534_v12, %v3806_v13  ;;  %v4405_v12 = vld [vmem:[#allocation5 + $0x74] sm:$0xf]  ;;  %v3425_v13 = vor.u32 %v4438_v3, %v3422_v4 }
 0x124   : > { %2380 = vmatpush.bf16.msra.mxu3 %v3409_v20  ;;  %v3805_v20 = vor.u32 %v4550_v10, %v3804_v8  ;;  %v3284_v10 = vld [vmem:[#allocation5 + $0x70] sm:$0xf] }
 0x126   : > { %2342 = vmatpush.bf16.msra.mxu0 %v3269_v28  ;;  %2355 = vmatpush.bf16.msra.mxu1 %v3273_v33  ;;  %v2136_v11 = vpop.f32.mrf.mxu0  ;;  %v2149_v17 = vpop.f32.mrf.mxu1  ;;  %v4518_v28 = vld [vmem:[#allocation5 + $0x3f4] sm:$0xf0]  ;;  %v689_v33 = vperm.slane %v5338_v55, 2 }
 0x127   : > { %2368 = vmatpush.bf16.msra.mxu2 %v3277_v34  ;;  %v2137_v15 = vadd.f32 %v2136_v11, %v687_v62  ;;  %v2150_v21 = vadd.f32 %v2149_v17, %v688_v5  ;;  %v3413_v5 = vor.u32 %v4453_v54, %v3412_v53  ;;  %v4421_v11 = vld [vmem:[#allocation5 + $0xec] sm:$0xf0]  ;;  %v4422_v17 = vld [vmem:[#allocation5 + $0xf4] sm:$0xf0] }
 0x128   : > { %2381 = vmatpush.bf16.msra.mxu3 %v3281_v37  ;;  %v3673_v37 = vor.u32 %v4501_v23, %v3670_v24  ;;  %v3285_v22 = vor.u32 %v4421_v11, %v3284_v10 }
 0x129   : > { %2343 = vmatmul.bf16.vlgmr.msra.gmra.mxu0 %v5297_v63  ;;  %2356 = vmatmul.bf16.vlgmr.msra.gmra.mxu1 %v5297_v63  ;;  %v2447_v25 = vmax.f32 %v2137_v15, 0.0  ;;  %v2448_v29 = vmax.f32 %v2150_v21, 0.0  ;;  %v3286_v15 = vld [vmem:[#allocation5 + $0xf0] sm:$0xf0] }
 0x12a   : > { %2387 = vmatpush.bf16.msrb.mxu0 %v4181_v38  ;;  %2400 = vmatpush.bf16.msrb.mxu1 %v4185_v39  ;;  %v3677_v38 = vor.u32 %v4518_v28, %v3676_v27  ;;  %v3540_v39 = vld [vmem:[#allocation5 + $0x270] sm:$0xf]  ;;  %v3289_v23 = vor.u32 %v4405_v12, %v3286_v15  ;;  %v692_v27 = vperm.slane %v5338_v55, 5 }
 0x12b   : > { %2413 = vmatpush.bf16.msrb.mxu2 %v4189_v40  ;;  %2382 = vmatmul.bf16.vlgmr.msra.gmra.mxu3 %v5297_v63  ;;  %v2478_v34 = vmax.f32 %v5336_v9, %v2447_v25  ;;  %v4485_v40 = vld [vmem:[#allocation5 + $0x2ec] sm:$0xf0] }
 0x12c   : > { %2426 = vmatpush.bf16.msrb.mxu3 %v4193_v44  ;;  %2369 = vmatmul.bf16.vlgmr.msra.gmra.mxu2 %v5297_v63 }
 0x12d   : > { %v2479_v42 = vmax.f32 %v2478_v34, %v2448_v29 }
 0x12e   : > { %2388 = vmatpush.bf16.msrb.mxu0 %v4053_v50  ;;  %2401 = vmatpush.bf16.msrb.mxu1 %v4057_v14  ;;  %v2175_v9 = vpop.f32.mrf.mxu3  ;;  %v3550_v50 = vld [vmem:[#allocation5 + $0x2f8] sm:$0xf0]  ;;  %v2138_v51 = vpop.f32.mrf.mxu0 }
 0x12f   : > { %2414 = vmatpush.bf16.msrb.mxu2 %v4061_v52  ;;  %v2162_v44 = vpop.f32.mrf.mxu2  ;;  %v2176_v14 = vadd.f32 %v2175_v9, %v690_v36  ;;  %v3541_v52 = vor.u32 %v4485_v40, %v3540_v39  ;;  %v3553_v62 = vor.u32 %v4470_v49, %v3550_v50  ;;  %v5357_v49 = vld [vmem:[#allocation7 + $0x10] sm:$0xff] }
 0x130   : > { %2427 = vmatpush.bf16.msrb.mxu3 %v4065_v56  ;;  %v2163_v48 = vadd.f32 %v2162_v44, %v689_v33  ;;  %v2151_v56 = vpop.f32.mrf.mxu1  ;;  %v695_v50 = vperm.slane %v5357_v49, 0  ;;  %v696_v51 = vperm.slane %v5357_v49, 1 }
 0x132   : > { %2389 = vmatpush.bf16.msrb.mxu0 %v3925_v61  ;;  %2402 = vmatpush.bf16.msrb.mxu1 %v3929_v1  ;;  %v2449_v57 = vmax.f32 %v2163_v48, 0.0  ;;  %v2450_v61 = vmax.f32 %v2176_v14, 0.0  ;;  %v4454_v1 = vld [vmem:[#allocation5 + $0x1f4] sm:$0xf0] }
 0x133   : > { %2415 = vmatpush.bf16.msrb.mxu2 %v3933_v2  ;;  %v3421_v8 = vor.u32 %v4454_v1, %v3420_v0 }
 0x134   : > { %2428 = vmatpush.bf16.msrb.mxu3 %v3937_v6  ;;  %v2480_v2 = vmax.f32 %v2479_v42, %v2449_v57  ;;  %v697_v57 = vperm.slane %v5357_v49, 2 }
 0x136   : > { %2390 = vmatpush.bf16.msrb.mxu0 %v3797_v16  ;;  %2403 = vmatpush.bf16.msrb.mxu1 %v3801_v19  ;;  %v2481_v6 = vmax.f32 %v2480_v2, %v2450_v61  ;;  %v3292_v16 = vld [vmem:[#allocation5 + $0x78] sm:$0xf]  ;;  %v4406_v19 = vld [vmem:[#allocation5 + $0x7c] sm:$0xf]  ;;  %v2177_v21 = vpop.f32.mrf.mxu3 }
 0x137   : > { %2416 = vmatpush.bf16.msrb.mxu2 %v3805_v20  ;;  %v2164_v18 = vpop.f32.mrf.mxu2  ;;  %v3294_v20 = vld [vmem:[#allocation5 + $0xf8] sm:$0xf0]  ;;  %v3293_v24 = vor.u32 %v4422_v17, %v3292_v16  ;;  %v4280_v17 = vld [vmem:[#allocation8 + $0xa8] sm:$0xf]  ;;  %v4282_v21 = vld [vmem:[#allocation8 + $0xb4] sm:$0xf0] }
 0x138   : > { %2429 = vmatpush.bf16.msrb.mxu3 %v3809_v26  ;;  %v3297_v25 = vor.u32 %v4406_v19, %v3294_v20  ;;  %v691_v26 = vperm.slane %v5338_v55, 4  ;;  %v4669_v18 = vld [vmem:[#allocation8 + $0xb0] sm:$0xf0]  ;;  %v4668_v19 = vld [vmem:[#allocation8 + $0xac] sm:$0xf] }
 0x139   : > { %v4281_v20 = vor.u32 %v4669_v18, %v4280_v17  ;;  %v4655_v18 = vld [vmem:[#allocation8 + $0x40] sm:$0xf0] }
 0x13a   : > { %2391 = vmatpush.bf16.msrb.mxu0 %v3669_v35  ;;  %2404 = vmatpush.bf16.msrb.mxu1 %v3673_v37  ;;  %v693_v35 = vperm.slane %v5338_v55, 6  ;;  %v694_v37 = vperm.slane %v5338_v55, 7 }
 0x13b   : > { %2417 = vmatpush.bf16.msrb.mxu2 %v3677_v38 }
 0x13c   : > { %2430 = vmatpush.bf16.msrb.mxu3 %v3681_v43 }
 0x13e   : > { %2392 = vmatpush.bf16.msrb.mxu0 %v3541_v52  ;;  %2405 = vmatpush.bf16.msrb.mxu1 %v3545_v58 }
 0x13f   : > { %2418 = vmatpush.bf16.msrb.mxu2 %v3549_v30  ;;  %v698_v30 = vperm.slane %v5357_v49, 3 }
 0x140   : > { %2431 = vmatpush.bf16.msrb.mxu3 %v3553_v62 }
 0x142   : > { %2393 = vmatpush.bf16.msrb.mxu0 %v3413_v5  ;;  %2406 = vmatpush.bf16.msrb.mxu1 %v3417_v7 }
 0x143   : > { %2419 = vmatpush.bf16.msrb.mxu2 %v3421_v8 }
 0x144   : > { %2432 = vmatpush.bf16.msrb.mxu3 %v3425_v13 }
 0x146   : > { %2394 = vmatpush.bf16.msrb.mxu0 %v3285_v22  ;;  %2407 = vmatpush.bf16.msrb.mxu1 %v3289_v23  ;;  %v2188_v28 = vpop.f32.mrf.mxu0  ;;  %v2201_v31 = vpop.f32.mrf.mxu1  ;;  %v4288_v22 = vld [vmem:[#allocation8 + $0xb0] sm:$0xf]  ;;  %v4670_v23 = vld [vmem:[#allocation8 + $0xb8] sm:$0xf0] }
 0x147   : > { %2420 = vmatpush.bf16.msrb.mxu2 %v3293_v24  ;;  %v2189_v29 = vadd.f32 %v2188_v28, %v691_v26  ;;  %v2202_v32 = vadd.f32 %v2201_v31, %v692_v27  ;;  %v4285_v24 = vor.u32 %v4668_v19, %v4282_v21  ;;  %v4268_v26 = vld [vmem:[#allocation8 + $0x90] sm:$0xf]  ;;  %v4666_v27 = vld [vmem:[#allocation8 + $0x98] sm:$0xf0]  ;;  %v4665_v28 = vld [vmem:[#allocation8 + $0x94] sm:$0xf] }
 0x148   : > { %2433 = vmatpush.bf16.msrb.mxu3 %v3297_v25  ;;  %v4289_v25 = vor.u32 %v4670_v23, %v4288_v22  ;;  %v4269_v31 = vor.u32 %v4666_v27, %v4268_v26  ;;  %v701_v19 = vperm.slane %v5357_v49, 6  ;;  %v4208_v22 = vld [vmem:[#allocation8 + $0x18] sm:$0xf]  ;;  %v4650_v26 = vld [vmem:[#allocation8 + $0x1c] sm:$0xf] }
 0x149   : > { %2395 = vmatmul.bf16.vlgmr.msrb.gmra.mxu0 %v5297_v63  ;;  %2408 = vmatmul.bf16.vlgmr.msrb.gmra.mxu1 %v5297_v63  ;;  %v2451_v33 = vmax.f32 %v2189_v29, 0.0  ;;  %v2452_v34 = vmax.f32 %v2202_v32, 0.0  ;;  %v4270_v32 = vld [vmem:[#allocation8 + $0x9c] sm:$0xf0]  ;;  %v4210_v27 = vld [vmem:[#allocation8 + $0x24] sm:$0xf0] }
 0x14a   : > { %2421 = vmatmul.bf16.vlgmr.msrb.gmra.mxu2 %v5297_v63  ;;  %2671 = vmatpush.bf16.msra.mxu0 %v4281_v20 }
 0x14b   : > { %2434 = vmatmul.bf16.vlgmr.msrb.gmra.mxu3 %v5297_v63  ;;  %v2482_v36 = vmax.f32 %v2481_v6, %v2451_v33  ;;  %v4276_v33 = vld [vmem:[#allocation8 + $0x98] sm:$0xf]  ;;  %2684 = vmatpush.bf16.msra.mxu1 %v4285_v24 }
 0x14c   : > { %2697 = vmatpush.bf16.msra.mxu2 %v4289_v25 }
 0x14d   : > { %v2483_v38 = vmax.f32 %v2482_v36, %v2452_v34  ;;  %v4667_v34 = vld [vmem:[#allocation8 + $0xa0] sm:$0xf0]  ;;  %v4273_v36 = vor.u32 %v4665_v28, %v4270_v32  ;;  %v4216_v28 = vld [vmem:[#allocation8 + $0x20] sm:$0xf] }
 0x14e   : > { %v2227_v41 = vpop.f32.mrf.mxu3  ;;  %v2190_v63 = vpop.f32.mrf.mxu0  ;;  %2672 = vmatpush.bf16.msra.mxu0 %v4269_v31 }
 0x14f   : > { %v2214_v39 = vpop.f32.mrf.mxu2  ;;  %v2228_v42 = vadd.f32 %v2227_v41, %v694_v37  ;;  %v2203_v43 = vpop.f32.mrf.mxu1  ;;  %v4277_v37 = vor.u32 %v4667_v34, %v4276_v33  ;;  %v4258_v41 = vld [vmem:[#allocation8 + $0x84] sm:$0xf0]  ;;  %v4264_v63 = vld [vmem:[#allocation8 + $0x80] sm:$0xf]  ;;  %2685 = vmatpush.bf16.msra.mxu1 %v4273_v36  ;;  %v4213_v33 = vor.u32 %v4650_v26, %v4210_v27  ;;  %v4652_v34 = vld [vmem:[#allocation8 + $0x28] sm:$0xf0] }
 0x150   : > { %v2215_v40 = vadd.f32 %v2214_v39, %v693_v35  ;;  %v4663_v39 = vld [vmem:[#allocation8 + $0x80] sm:$0xf0]  ;;  %v702_v36 = vperm.slane %v5357_v49, 7  ;;  %v4682_v26 = vld [vmem:[#allocation11 + $0x58] sm:$0xff] }
 0x151   : > { %v2454_v45 = vmax.f32 %v2228_v42, 0.0  ;;  %v4664_v42 = vld [vmem:[#allocation8 + $0x88] sm:$0xf0]  ;;  %2698 = vmatpush.bf16.msra.mxu2 %v4277_v37 }
 0x152   : > { %v2453_v44 = vmax.f32 %v2215_v40, 0.0  ;;  %v4662_v40 = vld [vmem:[#allocation8 + $0x7c] sm:$0xf] }
 0x154   : > { %v2484_v46 = vmax.f32 %v2483_v38, %v2453_v44  ;;  %v4256_v38 = vld [vmem:[#allocation8 + $0x78] sm:$0xf]  ;;  %v4261_v44 = vor.u32 %v4662_v40, %v4258_v41 }
 0x155   : > { %v4257_v43 = vor.u32 %v4663_v39, %v4256_v38  ;;  %v4217_v38 = vor.u32 %v4652_v34, %v4216_v28  ;;  %v4648_v39 = vld [vmem:[#allocation8 + $0x8] sm:$0xf0]  ;;  %v4673_v34 = vld [vmem:[#allocation11 + $0x10] sm:$0xff] }
 0x156   : > { %v2485_v47 = vmax.f32 %v2484_v46, %v2454_v45  ;;  %v2229_v9 = vpop.f32.mrf.mxu3  ;;  %v4265_v45 = vor.u32 %v4664_v42, %v4264_v63  ;;  %v4244_v46 = vld [vmem:[#allocation8 + $0x60] sm:$0xf]  ;;  %2686 = vmatpush.bf16.msra.mxu1 %v4261_v44  ;;  %v4198_v44 = vld [vmem:[#allocation8 + $0xc] sm:$0xf0] }
 0x157   : > { %v2216_v48 = vpop.f32.mrf.mxu2  ;;  %v4246_v9 = vld [vmem:[#allocation8 + $0x6c] sm:$0xf0]  ;;  %2673 = vmatpush.bf16.msra.mxu0 %v4257_v43  ;;  %v4647_v43 = vld [vmem:[#allocation8 + $0x4] sm:$0xf] }
 0x158   : > { %v4659_v48 = vld [vmem:[#allocation8 + $0x64] sm:$0xf]  ;;  %2699 = vmatpush.bf16.msra.mxu2 %v4265_v45  ;;  %v4201_v45 = vor.u32 %v4647_v43, %v4198_v44 }
 0x166   : > { %v2240_v55 = vpop.f32.mrf.mxu0  ;;  %v2253_v52 = vpop.f32.mrf.mxu1 }
 0x167   : > { %v2241_v14 = vadd.f32 %v2240_v55, %v695_v50  ;;  %v2254_v53 = vadd.f32 %v2253_v52, %v696_v51  ;;  %v4252_v50 = vld [vmem:[#allocation8 + $0x68] sm:$0xf]  ;;  %v4661_v51 = vld [vmem:[#allocation8 + $0x70] sm:$0xf0] }
 0x168   : > { %v4253_v52 = vor.u32 %v4661_v51, %v4252_v50 }
 0x169   : > { %v2455_v54 = vmax.f32 %v2241_v14, 0.0  ;;  %v2456_v56 = vmax.f32 %v2254_v53, 0.0  ;;  %v4249_v14 = vor.u32 %v4659_v48, %v4246_v9  ;;  %v699_v53 = vperm.slane %v5357_v49, 4 }
 0x16a   : > { %2700 = vmatpush.bf16.msra.mxu2 %v4253_v52  ;;  %v4686_v52 = vld [vmem:[#allocation11 + $0x78] sm:$0xff] }
 0x16b   : > { %v2486_v58 = vmax.f32 %v2485_v47, %v2455_v54  ;;  %v4660_v47 = vld [vmem:[#allocation8 + $0x68] sm:$0xf0]  ;;  %2687 = vmatpush.bf16.msra.mxu1 %v4249_v14  ;;  %v4232_v54 = vld [vmem:[#allocation8 + $0x48] sm:$0xf]  ;;  %v4678_v14 = vld [vmem:[#allocation11 + $0x38] sm:$0xff] }
 0x16c   : > { %v4245_v55 = vor.u32 %v4660_v47, %v4244_v46  ;;  %v4204_v46 = vld [vmem:[#allocation8 + $0x8] sm:$0xf]  ;;  %2922 = vmatpush.bf16.msra.mxu3 %v4678_v14 }
 0x16d   : > { %v2487_v59 = vmax.f32 %v2486_v58, %v2456_v56  ;;  %v4657_v56 = vld [vmem:[#allocation8 + $0x50] sm:$0xf0]  ;;  %v4687_v14 = vld [vmem:[#allocation11 + $0x80] sm:$0xff] }
 0x16e   : > { %v2279_v62 = vpop.f32.mrf.mxu3  ;;  %v2242_v0 = vpop.f32.mrf.mxu0  ;;  %2674 = vmatpush.bf16.msra.mxu0 %v4245_v55  ;;  %v4233_v58 = vor.u32 %v4657_v56, %v4232_v54 }
 0x16f   : > { %v2266_v60 = vpop.f32.mrf.mxu2  ;;  %v2280_v1 = vadd.f32 %v2279_v62, %v698_v30  ;;  %v2255_v2 = vpop.f32.mrf.mxu1  ;;  %v4234_v30 = vld [vmem:[#allocation8 + $0x54] sm:$0xf0] }
 0x170   : > { %v2267_v61 = vadd.f32 %v2266_v60, %v697_v57  ;;  %v4656_v57 = vld [vmem:[#allocation8 + $0x4c] sm:$0xf]  ;;  %v4658_v60 = vld [vmem:[#allocation8 + $0x58] sm:$0xf0] }
 0x171   : > { %v2458_v4 = vmax.f32 %v2280_v1, 0.0  ;;  %v4237_v62 = vor.u32 %v4656_v57, %v4234_v30  ;;  %v4694_v57 = vld [vmem:[#allocation11 + $0xb8] sm:$0xff] }
 0x172   : > { %v2457_v3 = vmax.f32 %v2267_v61, 0.0  ;;  %2675 = vmatpush.bf16.msra.mxu0 %v4233_v58  ;;  %v4685_v58 = vld [vmem:[#allocation11 + $0x70] sm:$0xff] }
 0x173   : > { %2688 = vmatpush.bf16.msra.mxu1 %v4237_v62 }
 0x174   : > { %v2488_v5 = vmax.f32 %v2487_v59, %v2457_v3  ;;  %v4240_v59 = vld [vmem:[#allocation8 + $0x50] sm:$0xf] }
 0x175   : > { %v4241_v0 = vor.u32 %v4658_v60, %v4240_v59  ;;  %v4220_v3 = vld [vmem:[#allocation8 + $0x30] sm:$0xf]  ;;  %v4693_v60 = vld [vmem:[#allocation11 + $0xb0] sm:$0xff] }
 0x176   : > { %v5363_v6 = vmax.f32 %v2488_v5, %v2458_v4  ;;  %v2281_v8 = vpop.f32.mrf.mxu3  ;;  %v4654_v4 = vld [vmem:[#allocation8 + $0x38] sm:$0xf0]  ;;  %v4653_v5 = vld [vmem:[#allocation8 + $0x34] sm:$0xf] }
 0x177   : > { %v2268_v7 = vpop.f32.mrf.mxu2  ;;  %2701 = vmatpush.bf16.msra.mxu2 %v4241_v0  ;;  %v4221_v8 = vor.u32 %v4654_v4, %v4220_v3  ;;  %v4684_v3 = vld [vmem:[#allocation11 + $0x68] sm:$0xff] }
 0x178   : > { %v700_v7 = vperm.slane %v5357_v49, 5 }
 0x179   : > { %2676 = vmatpush.bf16.msra.mxu0 %v4221_v8 }
 0x186   : > { %v5365_v10 = vpop.f32.mrf.mxu0  ;;  %v5367_v11 = vpop.f32.mrf.mxu1 }
 0x187   : > { %v2293_v2 = vadd.f32 %v5365_v10, %v699_v53  ;;  %v4651_v10 = vld [vmem:[#allocation8 + $0x20] sm:$0xf0]  ;;  %v2306_v23 = vadd.f32 %v5367_v11, %v700_v7  ;;  %v4196_v11 = vld [vmem:[#allocation8] sm:$0xf]  ;;  %v4692_v7 = vld [vmem:[#allocation11 + $0xa8] sm:$0xff] }
 0x188   : > { %v4209_v25 = vor.u32 %v4651_v10, %v4208_v22  ;;  %v4197_v42 = vor.u32 %v4648_v39, %v4196_v11 }
 0x189   : > { %v2459_v21 = vmax.f32 %v2293_v2, 0.0  ;;  %v2460_v41 = vmax.f32 %v2306_v23, 0.0  ;;  %v4676_v2 = vld [vmem:[#allocation11 + $0x28] sm:$0xff] }
 0x18a   : > { %2677 = vmatpush.bf16.msra.mxu0 %v4209_v25  ;;  %v4674_v25 = vld [vmem:[#allocation11 + $0x18] sm:$0xff] }
 0x18b   : > { %v2490_v40 = vmax.f32 %v5363_v6, %v2459_v21 }
 0x18d   : > { %v2491_v9 = vmax.f32 %v2490_v40, %v2460_v41 }
 0x18e   : > { %v5371_v13 = vpop.f32.mrf.mxu3  ;;  %v2294_v15 = vpop.f32.mrf.mxu0  ;;  %2678 = vmatpush.bf16.msra.mxu0 %v4197_v42 }
 0x18f   : > { %v5369_v12 = vpop.f32.mrf.mxu2  ;;  %v2307_v16 = vpop.f32.mrf.mxu1  ;;  %v4222_v15 = vld [vmem:[#allocation8 + $0x3c] sm:$0xf0]  ;;  %v2332_v49 = vadd.f32 %v5371_v13, %v702_v36  ;;  %v4677_v13 = vld [vmem:[#allocation11 + $0x30] sm:$0xff] }
 0x190   : > { %v4228_v16 = vld [vmem:[#allocation8 + $0x38] sm:$0xf]  ;;  %v4225_v17 = vor.u32 %v4653_v5, %v4222_v15  ;;  %2923 = vmatpush.bf16.msra.mxu3 %v4677_v13 }
 0x191   : > { %v4229_v20 = vor.u32 %v4655_v18, %v4228_v16  ;;  %v2462_v54 = vmax.f32 %v2332_v49, 0.0  ;;  %v4690_v49 = vld [vmem:[#allocation11 + $0x98] sm:$0xff] }
 0x192   : > { %2689 = vmatpush.bf16.msra.mxu1 %v4225_v17  ;;  %2935 = vmatpush.bf16.msrb.mxu0 %v4686_v52  ;;  %v4683_v17 = vld [vmem:[#allocation11 + $0x60] sm:$0xff]  ;;  %v2535_v52 = vld [vmem:[%s5453_s4] sm:$0x7] }
 0x193   : > { %2702 = vmatpush.bf16.msra.mxu2 %v4229_v20  ;;  %v4691_v20 = vld [vmem:[#allocation11 + $0xa0] sm:$0xff] }
 0x194   : > { %2924 = vmatpush.bf16.msra.mxu3 %v4676_v2 }
 0x196   : > { %v2333_v35 = vpop.f32.mrf.mxu3  ;;  %2690 = vmatpush.bf16.msra.mxu1 %v4213_v33  ;;  %2936 = vmatpush.bf16.msrb.mxu0 %v4685_v58 }
 0x197   : > { %v2320_v29 = vpop.f32.mrf.mxu2  ;;  %v2319_v35 = vadd.f32 %v5369_v12, %v701_v19  ;;  %2703 = vmatpush.bf16.msra.mxu2 %v4217_v38  ;;  %v4649_v12 = vld [vmem:[#allocation8 + $0x10] sm:$0xf0] }
 0x198   : > { %v5380_v29 = vld [vmem:[#allocation7 + $0x18] sm:$0xff]  ;;  %v4205_v48 = vor.u32 %v4649_v12, %v4204_v46 }
 0x199   : > { %v703_v63 = vperm.slane %v5380_v29, 0  ;;  %v2461_v47 = vmax.f32 %v2319_v35, 0.0  ;;  %v704_v6 = vperm.slane %v5380_v29, 1  ;;  %v705_v56 = vperm.slane %v5380_v29, 2  ;;  %v4681_v35 = vld [vmem:[#allocation11 + $0x50] sm:$0xff] }
 0x19a   : > { %2691 = vmatpush.bf16.msra.mxu1 %v4201_v45  ;;  %v706_v0 = vperm.slane %v5380_v29, 3  ;;  %v707_v16 = vperm.slane %v5380_v29, 4  ;;  %2937 = vmatpush.bf16.msrb.mxu0 %v4684_v3  ;;  %v708_v19 = vperm.slane %v5380_v29, 5  ;;  %v710_v33 = vperm.slane %v5380_v29, 7 }
 0x19b   : > { %2704 = vmatpush.bf16.msra.mxu2 %v4205_v48  ;;  %v2492_v53 = vmax.f32 %v2491_v9, %v2461_v47  ;;  %v4672_v48 = vld [vmem:[#allocation11 + $0x8] sm:$0xff] }
 0x19c   : > { %v4680_v9 = vld [vmem:[#allocation11 + $0x48] sm:$0xff] }
 0x19e   : > { %2948 = vmatpush.bf16.msrb.mxu1 %v4694_v57  ;;  %2938 = vmatpush.bf16.msrb.mxu0 %v4683_v17 }
 0x1a2   : > { %2949 = vmatpush.bf16.msrb.mxu1 %v4693_v60  ;;  %2939 = vmatpush.bf16.msrb.mxu0 %v4682_v26 }
 0x1a6   : > { %v2344_v61 = vpop.f32.mrf.mxu0  ;;  %v5374_v1 = vpop.f32.mrf.mxu1  ;;  %2950 = vmatpush.bf16.msrb.mxu1 %v4692_v7  ;;  %2940 = vmatpush.bf16.msrb.mxu0 %v4681_v35 }
 0x1a7   : > { %v2345_v50 = vadd.f32 %v2344_v61, %v703_v63  ;;  %v2358_v59 = vadd.f32 %v5374_v1, %v704_v6  ;;  %v2493_v61 = vmax.f32 %v2492_v53, %v2462_v54  ;;  %v4675_v1 = vld [vmem:[#allocation11 + $0x20] sm:$0xff]  ;;  %v2713_v53 = vld [vmem:[#allocation10] sm:$0x7]  ;;  %v2537_v54 = vperm.slane %v2535_v52, 0 }
 0x1a8   : > { %2925 = vmatpush.bf16.msra.mxu3 %v4675_v1  ;;  %v4671_v6 = vld [vmem:[#allocation11] sm:$0xff]  ;;  %v2715_v57 = vperm.slane %v2713_v53, 0  ;;  %v2716_v13 = vperm.slane %v2713_v53, 1 }
 0x1a9   : > { %v2463_v30 = vmax.f32 %v2345_v50, 0.0  ;;  %v2464_v5 = vmax.f32 %v2358_v59, 0.0  ;;  %v4689_v50 = vld [vmem:[#allocation11 + $0x90] sm:$0xff] }
 0x1aa   : > { %2951 = vmatpush.bf16.msrb.mxu1 %v4691_v20  ;;  %2941 = vmatpush.bf16.msrb.mxu0 %v4680_v9 }
 0x1ab   : > { %v2494_v4 = vmax.f32 %v2493_v61, %v2463_v30 }
 0x1ac   : > { %2926 = vmatpush.bf16.msra.mxu3 %v4674_v25 }
 0x1ad   : > { %v2495_v18 = vmax.f32 %v2494_v4, %v2464_v5  ;;  %v2717_v4 = vperm.slane %v2713_v53, 2 }
 0x1ae   : > { %v2383_v31 = vpop.f32.mrf.mxu3  ;;  %v2346_v32 = vpop.f32.mrf.mxu0  ;;  %2952 = vmatpush.bf16.msrb.mxu1 %v4690_v49 }
 0x1af   : > { %v2370_v24 = vpop.f32.mrf.mxu2  ;;  %v2359_v37 = vpop.f32.mrf.mxu1  ;;  %v2384_v15 = vadd.f32 %v2383_v31, %v706_v0  ;;  %v709_v32 = vperm.slane %v5380_v29, 6  ;;  %v2539_v0 = vperm.slane %v2535_v52, 2 }
 0x1b0   : > { %v2371_v62 = vadd.f32 %v2370_v24, %v705_v56  ;;  %2927 = vmatpush.bf16.msra.mxu3 %v4673_v34  ;;  %v2538_v56 = vperm.slane %v2535_v52, 1 }
 0x1b1   : > { %v2466_v22 = vmax.f32 %v2384_v15, 0.0 }
 0x1b2   : > { %v2465_v8 = vmax.f32 %v2371_v62, 0.0  ;;  %2953 = vmatpush.bf16.msrb.mxu1 %v4689_v50 }
 0x1b4   : > { %v2496_v21 = vmax.f32 %v2495_v18, %v2465_v8  ;;  %2928 = vmatpush.bf16.msra.mxu3 %v4672_v48 }
 0x1b6   : > { %v2385_v55 = vpop.f32.mrf.mxu3  ;;  %v2497_v31 = vmax.f32 %v2496_v21, %v2466_v22 }
 0x1b7   : > { %v2372_v51 = vpop.f32.mrf.mxu2  ;;  %v4688_v55 = vld [vmem:[#allocation11 + $0x88] sm:$0xff] }
 0x1b8   : > { %v4679_v51 = vld [vmem:[#allocation11 + $0x40] sm:$0xff]  ;;  %2929 = vmatpush.bf16.msra.mxu3 %v4671_v6  ;;  %2954 = vmatpush.bf16.msrb.mxu1 %v4688_v55 }
 0x1b9   : > { %2942 = vmatpush.bf16.msrb.mxu0 %v4679_v51 }
 0x1bc   : > { %2955 = vmatpush.bf16.msrb.mxu1 %v4687_v14 }
 0x1c6   : > { %v2396_v10 = vpop.f32.mrf.mxu0  ;;  %v2409_v24 = vpop.f32.mrf.mxu1 }
 0x1c7   : > { %v2397_v23 = vadd.f32 %v2396_v10, %v707_v16  ;;  %v2410_v27 = vadd.f32 %v2409_v24, %v708_v19 }
 0x1c9   : > { %v2467_v28 = vmax.f32 %v2397_v23, 0.0  ;;  %v2468_v37 = vmax.f32 %v2410_v27, 0.0 }
 0x1cb   : > { %v2498_v36 = vmax.f32 %v2497_v31, %v2467_v28 }
 0x1cd   : > { %v2422_v38 = vpop.f32.mrf.mxu2  ;;  %v2499_v42 = vmax.f32 %v2498_v36, %v2468_v37 }
 0x1ce   : > { %v2423_v11 = vadd.f32 %v2422_v38, %v709_v32  ;;  %v2435_v39 = vpop.f32.mrf.mxu3  ;;  %v2398_v40 = vpop.f32.mrf.mxu0 }
 0x1cf   : > { %v2436_v41 = vadd.f32 %v2435_v39, %v710_v33  ;;  %v2411_v63 = vpop.f32.mrf.mxu1 }
 0x1d0   : > { %v2469_v43 = vmax.f32 %v2423_v11, 0.0 }
 0x1d1   : > { %v2470_v44 = vmax.f32 %v2436_v41, 0.0 }
 0x1d2   : > { %v2500_v45 = vmax.f32 %v2499_v42, %v2469_v43 }
 0x1d4   : > { %v2501_v46 = vmax.f32 %v2500_v45, %v2470_v44 }
 0x1d5   : > { %v2424_v29 = vpop.f32.mrf.mxu2 }
 0x1d6   : > { %v2502_v12 = vpack.c.bf16 %v2501_v46, %v2501_v46  ;;  %v2437_v47 = vpop.f32.mrf.mxu3 }
 0x1d8   : > { %2679 = vmatmul.bf16.vlgmr.msra.gmra.mxu0 %v2502_v12  ;;  %2692 = vmatmul.bf16.vlgmr.msra.gmra.mxu1 %v2502_v12 }
 0x1d9   : > { %2705 = vmatmul.bf16.vlgmr.msra.gmra.mxu2 %v2502_v12 }
 0x255   : > { %v2680_v58 = vpop.f32.mrf.mxu0  ;;  %v2693_v30 = vpop.f32.mrf.mxu1 }
 0x256   : > { %v2681_v59 = vadd.f32 %v2680_v58, %v2537_v54  ;;  %v2694_v60 = vadd.f32 %v2693_v30, %v2538_v56 }
 0x258   : > { %2710 = vst [vmem:[%s405_s26] sm:$0xff] %v2681_v59  ;;  %v2721_v61 = vsub.f32 %v2681_v59, %v2715_v57  ;;  %v2722_v62 = vsub.f32 %v2694_v60, %v2716_v13 }
 0x259   : > { %2711 = vst [vmem:[%s405_s26 + $0x8] sm:$0xff] %v2694_v60 }
 0x25a   : > { %v2724_v2 = vmul.f32 %v2721_v61, %v2721_v61  ;;  %v2725_v3 = vmul.f32 %v2722_v62, %v2722_v62 }
 0x25c   : > { %v2727_v5 = vpack.c.bf16 %v2724_v2, %v2724_v2  ;;  %v2728_v7 = vpack.c.bf16 %v2725_v3, %v2725_v3  ;;  %v2706_v8 = vpop.f32.mrf.mxu2 }
 0x25d   : > { %v2707_v15 = vadd.f32 %v2706_v8, %v2539_v0  ;;  %v2682_v16 = vpop.f32.mrf.mxu0  ;;  %v2695_v1 = vpop.f32.mrf.mxu1 }
 0x25e   : > { %2930 = vmatmul.bf16.vlgmr.msra.gmra.mxu3 %v2727_v5  ;;  %2943 = vmatmul.bf16.vlgmr.msrb.gmra.mxu0 %v2728_v7 }
 0x25f   : > { %2712 = vst [vmem:[%s405_s26 + $0x10] sm:$0xff] %v2707_v15  ;;  %v2723_v17 = vsub.f32 %v2707_v15, %v2717_v4 }
 0x261   : > { %v2726_v18 = vmul.f32 %v2723_v17, %v2723_v17 }
 0x263   : > { %v2729_v19 = vpack.c.bf16 %v2726_v18, %v2726_v18 }
 0x264   : > { %v2708_v20 = vpop.f32.mrf.mxu2 }
 0x265   : > { %2956 = vmatmul.bf16.vlgmr.msrb.gmra.mxu1 %v2729_v19 }
 0x266   : > { %5014 = shalt.err (!%p5011_p9)
}
 0x267   : > { %4719 = dma.vmem_to_hbm [thread:$0]  (%p5241_p13), %s2985_s10, 384, %s2987_s24, %s2966_s25  }
 0x268   : > { %s4388_s16 = sshll.u32 %s5179_s12, 3  ;;  %s5469_s21 = sshll.u32 %s5272_s15, 3 }
 0x269   : > { %s2996_s23 = scalar_lea.hbm %s5457_s8, %s4388_s16  ;;  %s412_s10 = scalar_lea.vmem [#allocation14], %s5469_s21 }
 0x26a   : > { %s2998_s24 = sshll.u32 %s412_s10, 4  ;;  %s3000_s25 = sshll.u32 %s2996_s23, 4  ;;  %s2999_s24 = int_to_ptr.vmem [resolvable:$true] %s2998_s24  ;;  %s3001_s25 = int_to_ptr.hbm [resolvable:$true] %s3000_s25 }
 0x26b   : > { %s2971_s22 = scalar_lea.sflag [#allocation15], %s5272_s15  ;;  %s5029_s1 = sshra.s32 %s3001_s25, 4  ;;  %s5030_s1 = int_to_ptr.hbm [resolvable:$true] %s5029_s1 }
 0x26c   : > { %s5031_s12 = scalar_lea.hbm %s5030_s1, 8  ;;  %s5035_s19 = scalar_lea.hbm %s5457_s8, 16 }
 0x26d   : > { %p5032_p10 = scmp.ne.s32.totalorder %s5030_s1, %s5031_s12  ;;  %p5036_p2 = scmp.lt.s32.totalorder %s5030_s1, %s5457_s8 }
 0x26e   : > { %p5037_p6 = scmp.lt.s32.totalorder %s5035_s19, %s5031_s12 }
 0x26f   : > { %p5033_p11 = pnand %p5032_p10, %p5241_p13 }
 0x270   : > { %p5038_p1 = por %p5037_p6, %p5036_p2 }
 0x271   : > { %p5034_p0 = pneg %p5033_p11 }
 0x273   : > { %p5039_p3 = pnand %p5038_p1, %p5034_p0 }
 0x2db   : > { %v2944_v21 = vpop.f32.mrf.mxu0 }
 0x2e1   : > { %v2931_v22 = vpop.f32.mrf.mxu3 }
 0x2e2   : > { %v2945_v10 = vadd.f32 %v2944_v21, %v2931_v22  ;;  %v2957_v23 = vpop.f32.mrf.mxu1 }
 0x2e3   : > { %v2946_v24 = vpop.f32.mrf.mxu0 }
 0x2e4   : > { %v2958_v25 = vadd.f32 %v2957_v23, %v2945_v10 }
 0x2e6   : > { %v2961_v26 = vsub.f32 0.0, %v2958_v25 }
 0x2e8   : > { %v2962_v27 = vmul.f32 1.442695, %v2961_v26 }
 0x2e9   : > { %v2933_v28 = vpop.f32.mrf.mxu3 }
 0x2ea   : > { %4805 = vpow2.f32 %v2962_v27  ;;  %v2959_v31 = vpop.f32.mrf.mxu1 }
 0x2f0   : > { %v4806_v32 = vpop.eup %4805 }
 0x2f1   : > { %2964 = vst [vmem:[%s412_s10] sm:$0xff] %v4806_v32 }
 0x2f2   : > { %5042 = shalt.err (!%p5039_p3)
}
 0x2f3   : > { %4720 = dma.vmem_to_hbm [thread:$0]  (%p5241_p13), %s2999_s24, 128, %s3001_s25, %s2971_s22  }
 0x2f4 PF: > { %s3012_s15 = sand.u32 1, %s5085_s27   ;;  %p5470_p5 = scmp.ge.s32.totalorder %s5097_s30, 2 }
 0x2f5   : > { %s3013_s9 = scalar_lea.sflag [#allocation4], %s3012_s15 }
 0x2f6   : > { %p4744_p12 = pnand %p5470_p5, %p5246_p4 }
 0x2f8   : > { %p4745_p8 = pneg %p4744_p12 }
 0x2fa   : > { %5076 = dma.done.wait (%p4745_p8), %s3013_s9, 384  }
 0x2fb   : > { %5078 = vsyncadd (%p4745_p8), %s3013_s9, 4294966912  ;;  %s3023_s17 = scalar_lea.sflag [#allocation15], %s3012_s15 }
 0x2fc   : > { %5080 = dma.done.wait (%p4745_p8), %s3023_s17, 128  }
 0x2fd   : > { %5082 = vsyncadd (%p4745_p8), %s3023_s17, 4294967168  ;;  %p28_p13 = scmp.ge.s32.totalorder %s5221_s14, 4   ;;  %s5471_s27 = smov %s5089_s28 }
 0x2fe   : > { %s5472_s28 = smov %s5093_s29  ;;  %s5473_s29 = smov %s5233_s20 }
 0x2ff   : > { %s5474_s30 = smov %s5221_s14  ;;  %30 = sbr.rel (!%p28_p13) target bundleno = 13 (0xd), region = 130 }
 0x304   :  { %3029 = vsyncpa [#allocation3], 1 }
 0x305   :  { %3031 = vsyncpa [#allocation3 + $0x1], 1 }
 0x306   :  { %3032 = vsyncpa [#allocation6], 1 }
 0x307   :  { %3033 = vsyncpa [#allocation9], 1 }
 0x308   :  { %3034 = vsyncpa [#allocation12], 1 }
 0x309   :  { %3035 = vsyncpa [#allocation4], 1 }
 0x30a   :  { %3037 = vsyncpa [#allocation4 + $0x1], 1 }
 0x30b   :  { %3038 = vsyncpa [#allocation15], 1 }
 0x30c   :  { %3040 = vsyncpa [#allocation15 + $0x1], 1 }

</bundles_post_ra>
